<compile_context>
chip_gen: v6e
topology: v6e:2x2x1
jax: 0.10.0
libtpu: 0.0.40
codegen_flags: <defaults>
</compile_context>

<pallas_src>
import functools

import numpy as np
import jax
import jax.numpy as jnp
from jax.experimental import pallas as pl
from jax.experimental.pallas import tpu as pltpu


def _local_attn_kernel(mask_ref, q_ref, k_ref, v_ref, o_ref, *, scale, offs, W):
    """One batch image per grid step, lane-dense (d, N) layout."""
    q = q_ref[0]                              # (d, N), input dtype
    k = k_ref[0]                              # (d, N)
    N = q.shape[1]

    # ---- pass 1: K*K attention logits (fully unrolled) ---------------------
    # Window neighbor (dy, dx) of flat pixel n is flat pixel n + dy*W + dx for
    # every in-bounds neighbor, so one lane roll per window position suffices;
    # out-of-bounds (zero-padded) neighbors are wrapped by the roll but forced
    # to logit 0 / weight 0 by the precomputed mask, matching nn.Unfold.
    logits = []
    p = 0
    for dy in offs:
        for dx in offs:
            s = dy * W + dx
            k_p = k if s == 0 else pltpu.roll(k, shift=(-s) % N, axis=1)
            m_p = mask_ref[p]                                   # (1, N) f32
            lg = jnp.sum((q * k_p).astype(jnp.float32), axis=0, keepdims=True)
            logits.append(lg * scale * m_p)     # padded key -> logit exactly 0
            p += 1

    # ---- softmax over the window (attn_drop p=0 -> identity at inference) --
    m = logits[0]
    for lg in logits[1:]:
        m = jnp.maximum(m, lg)
    exps = [jnp.exp(lg - m) for lg in logits]
    den = exps[0]
    for e in exps[1:]:
        den = den + e
    inv = pl.reciprocal(den, approx=True)       # EUP slot

    # ---- pass 2: weighted sum of the (virtually unfolded) values -----------
    v = v_ref[0]                                # (d, N)
    acc = jnp.zeros(v.shape, jnp.float32)
    p = 0
    for dy in offs:
        for dx in offs:
            s = dy * W + dx
            v_p = v if s == 0 else pltpu.roll(v, shift=(-s) % N, axis=1)
            w = exps[p] * inv * mask_ref[p]                     # (1, N) f32
            acc = acc + (v_p * w.astype(v_p.dtype)).astype(jnp.float32)
            p += 1

    o_ref[0] = acc.astype(o_ref.dtype)          # lane-dense (d, N) store


def _window_mask(H, W, offs):
    """(KK, 1, H*W) f32 validity mask per window offset (zero-padded unfold)."""
    rows = np.arange(H)[:, None]
    cols = np.arange(W)[None, :]
    mats = []
    for dy in offs:
        for dx in offs:
            ok = ((rows + dy >= 0) & (rows + dy < H) &
                  (cols + dx >= 0) & (cols + dx < W))
            mats.append(ok.reshape(1, H * W))
    return np.stack(mats, axis=0).astype(np.float32)


def local_attention(q, k, v, *, head_dim, qk_scale=None, kernel_size=3,
                    dilation=1, channels_last=True, interpret=False):
    """Pallas implementation of LocalAttention.forward (dilation < 5 branch)."""
    # TODO(synk): dilation >= 5 falls back to GobalAttention (torch.topk over
    # all H*W keys + gather); that has no clean Pallas equivalent here and is
    # unreachable with the module's default dilation=1.
    assert dilation < 5, "global-attention branch not implemented"

    B, d, H, W = q.shape
    assert d == head_dim
    N = H * W
    KK = kernel_size * kernel_size
    scale = float(qk_scale) if qk_scale else float(head_dim) ** (-0.5)
    pad = dilation * (kernel_size - 1) // 2
    assert pad < H and pad < W, "window larger than the image"
    offs = tuple(i * dilation - pad for i in range(kernel_size))

    mask = jnp.asarray(_window_mask(H, W, offs))            # (KK, 1, N) f32

    # Free (contiguous) reshapes to the lane-dense layout.
    qf = q.reshape(B, d, N)
    kf = k.reshape(B, d, N)
    vf = v.reshape(B, d, N)

    # --- generation-aware VMEM budget: q/k/v/out double-buffered + mask +
    #     f32 accumulator / rolled-window / softmax temporaries --------------
    itemsize = q.dtype.itemsize
    est = (4 * 2 * d * N * itemsize          # q, k, v, out (x2 buffers)
           + 2 * KK * N * 4                  # window mask (x2 buffers)
           + 3 * d * N * 4                   # acc + live rolled windows
           + (2 * KK + 4) * N * 4)           # logits / exps / softmax slabs
    try:
        vmem_cap = int(pltpu.get_tpu_info().vmem_capacity_bytes)
    except Exception:                        # unknown chip / interpret mode
        vmem_cap = 64 << 20
    vmem_limit = int(min((vmem_cap * 3) // 4, max(2 * est, 32 << 20)))

    cost = pl.CostEstimate(
        flops=int(B * N * KK * (4 * d + 8)),
        transcendentals=int(B * N * (KK + 1)),
        bytes_accessed=int(4 * B * d * N * itemsize + KK * N * 4),
    )

    kernel = functools.partial(_local_attn_kernel, scale=scale, offs=offs, W=W)
    bdn_spec = lambda: pl.BlockSpec((1, d, N), lambda b: (b, 0, 0))

    out = pl.pallas_call(
        kernel,
        out_shape=jax.ShapeDtypeStruct((B, d, N), q.dtype),
        grid_spec=pltpu.PrefetchScalarGridSpec(
            num_scalar_prefetch=0,
            grid=(B,),
            in_specs=[
                pl.BlockSpec((KK, 1, N), lambda b: (0, 0, 0)),   # window mask
                bdn_spec(),                                      # q
                bdn_spec(),                                      # k
                bdn_spec(),                                      # v
            ],
            out_specs=bdn_spec(),
        ),
        # TODO(synk): grid=(B,) leaves one v7x TensorCore idle when B == 1;
        # intra-image row tiling needs overlapping (halo) blocks whose copies
        # outweigh the gain for this module's batch sizes.
        compiler_params=pltpu.CompilerParams(
            dimension_semantics=("parallel",),
            vmem_limit_bytes=vmem_limit),
        cost_estimate=cost,
        interpret=interpret,
    )(mask, qf, kf, vf)                                          # (B, d, N)

    out = out.reshape(B, d, H, W)
    if channels_last:
        # PyTorch module contract is (B, H, W, d).
        # TODO(synk): pass channels_last=False if the consumer accepts
        # (B, d, H, W) and fold this transpose into the next op.
        return jnp.transpose(out, (0, 2, 3, 1))
    return out


# ----------------------------- reference (plain JAX, test only) -------------
def _unfold(x, kernel_size, dilation, pad, H, W):
    # Mirrors nn.Unfold(kernel_size, dilation, padding=pad, stride=1).
    B, d = x.shape[0], x.shape[1]
    xp = jnp.pad(x, ((0, 0), (0, 0), (pad, pad), (pad, pad)))
    pats = []
    for ki in range(kernel_size):
        for kj in range(kernel_size):
            i0, j0 = ki * dilation, kj * dilation
            pats.append(xp[:, :, i0:i0 + H, j0:j0 + W])
    return jnp.stack(pats, axis=1).reshape(B, kernel_size * kernel_size, d, H * W)


def _reference(q, k, v, *, head_dim, kernel_size=3, dilation=1, qk_scale=None):
    B, d, H, W = q.shape
    scale = qk_scale if qk_scale else head_dim ** (-0.5)
    pad = dilation * (kernel_size - 1) // 2
    q2 = q.reshape(B, d, H * W)
    k_unf = _unfold(k, kernel_size, dilation, pad, H, W)
    v_unf = _unfold(v, kernel_size, dilation, pad, H, W)
    logits = jnp.einsum("bdn,bpdn->bpn", q2, k_unf) * scale
    attn = jax.nn.softmax(logits, axis=1)
    out = jnp.einsum("bpn,bpdn->bdn", attn, v_unf)
    return jnp.transpose(out, (0, 2, 1)).reshape(B, H, W, d)


if __name__ == "__main__":
    # Case 1: default LocalAttention config (kernel_size=3, dilation=1).
    B, head_dim, H, W = 2, 16, 16, 16
    kq, kk_, kv = jax.random.split(jax.random.PRNGKey(0), 3)
    q = jax.random.normal(kq, (B, head_dim, H, W), dtype=jnp.float32)
    k = jax.random.normal(kk_, (B, head_dim, H, W), dtype=jnp.float32)
    v = jax.random.normal(kv, (B, head_dim, H, W), dtype=jnp.float32)

    out = local_attention(q, k, v, head_dim=head_dim, kernel_size=3, dilation=1)
    out = jax.block_until_ready(out)
    ref = _reference(q, k, v, head_dim=head_dim, kernel_size=3, dilation=1)
    assert out.shape == (B, H, W, head_dim)
    assert jnp.allclose(out, ref, atol=1e-2, rtol=1e-2)

    # Case 2: dilated local window (dilation=2).
    out2 = local_attention(q, k, v, head_dim=head_dim, kernel_size=3, dilation=2)
    out2 = jax.block_until_ready(out2)
    ref2 = _reference(q, k, v, head_dim=head_dim, kernel_size=3, dilation=2)
    assert jnp.allclose(out2, ref2, atol=1e-2, rtol=1e-2)

    # Case 3: non-multiple-of-128 spatial size (14x14), channels-first output.
    B3, d3, H3, W3 = 1, 32, 14, 14
    k1, k2, k3 = jax.random.split(jax.random.PRNGKey(1), 3)
    q3 = jax.random.normal(k1, (B3, d3, H3, W3), dtype=jnp.float32)
    k3_ = jax.random.normal(k2, (B3, d3, H3, W3), dtype=jnp.float32)
    v3 = jax.random.normal(k3, (B3, d3, H3, W3), dtype=jnp.float32)
    out3 = local_attention(q3, k3_, v3, head_dim=d3, channels_last=False)
    out3 = jax.block_until_ready(out3)
    ref3 = _reference(q3, k3_, v3, head_dim=d3)
    assert out3.shape == (B3, d3, H3, W3)
    assert jnp.allclose(jnp.transpose(out3, (0, 2, 3, 1)), ref3,
                        atol=1e-2, rtol=1e-2)

    print("KERNEL_OK")
</pallas_src>

<mosaic_0001>
module attributes {stable_mosaic.version = 11 : i64} {
  func.func @_local_attn_kernel(%arg0: i32, %arg1: memref<9x1x256xf32, #tpu.memory_space<vmem>>, %arg2: memref<1x16x256xf32, #tpu.memory_space<vmem>>, %arg3: memref<1x16x256xf32, #tpu.memory_space<vmem>>, %arg4: memref<1x16x256xf32, #tpu.memory_space<vmem>>, %arg5: memref<1x16x256xf32, #tpu.memory_space<vmem>>) attributes {dimension_semantics = [#tpu.dimension_semantics<parallel>], iteration_bounds = array<i64: 2>, scalar_prefetch = 0 : i64, scratch_operands = 0 : i64, tpu.core_type = #tpu.core_type<tc>, window_params = [{pipeline_mode = #tpu.pipeline_mode<synchronous>, transform_indices = @transform_0, window_bounds = array<i64: 9, 1, 256>}, {transform_indices = @transform_1, window_bounds = array<i64: 1, 16, 256>}, {transform_indices = @transform_2, window_bounds = array<i64: 1, 16, 256>}, {transform_indices = @transform_3, window_bounds = array<i64: 1, 16, 256>}, {transform_indices = @transform_4, window_bounds = array<i64: 1, 16, 256>}]} {
    %c0 = arith.constant 0 : index
    %c0_0 = arith.constant 0 : index
    %c0_1 = arith.constant 0 : index
    %0 = vector.load %arg2[%c0, %c0_0, %c0_1] : memref<1x16x256xf32, #tpu.memory_space<vmem>>, vector<1x16x256xf32>
    %1 = vector.shape_cast %0 : vector<1x16x256xf32> to vector<16x256xf32>
    %c0_2 = arith.constant 0 : index
    %c0_3 = arith.constant 0 : index
    %c0_4 = arith.constant 0 : index
    %2 = vector.load %arg3[%c0_2, %c0_3, %c0_4] : memref<1x16x256xf32, #tpu.memory_space<vmem>>, vector<1x16x256xf32>
    %3 = vector.shape_cast %2 : vector<1x16x256xf32> to vector<16x256xf32>
    %c17_i32 = arith.constant 17 : i32
    %4 = tpu.dynamic_rotate %3 by %c17_i32 dim 1 : vector<16x256xf32>, i32 -> vector<16x256xf32>
    %c0_5 = arith.constant 0 : index
    %c0_6 = arith.constant 0 : index
    %c0_7 = arith.constant 0 : index
    %5 = vector.load %arg1[%c0_5, %c0_6, %c0_7] : memref<9x1x256xf32, #tpu.memory_space<vmem>>, vector<1x1x256xf32>
    %6 = vector.shape_cast %5 : vector<1x1x256xf32> to vector<1x256xf32>
    %7 = arith.mulf %1, %4 : vector<16x256xf32>
    %cst = arith.constant dense<0.000000e+00> : vector<256xf32>
    %8 = vector.multi_reduction <add>, %7, %cst [0] : vector<16x256xf32> to vector<256xf32>
    %9 = vector.shape_cast %8 : vector<256xf32> to vector<1x256xf32>
    %cst_8 = arith.constant 2.500000e-01 : f32
    %10 = vector.broadcast %cst_8 : f32 to vector<1x256xf32>
    %11 = arith.mulf %9, %10 : vector<1x256xf32>
    %12 = arith.mulf %11, %6 : vector<1x256xf32>
    %c16_i32 = arith.constant 16 : i32
    %13 = tpu.dynamic_rotate %3 by %c16_i32 dim 1 : vector<16x256xf32>, i32 -> vector<16x256xf32>
    %c1 = arith.constant 1 : index
    %c0_9 = arith.constant 0 : index
    %c0_10 = arith.constant 0 : index
    %14 = vector.load %arg1[%c1, %c0_9, %c0_10] : memref<9x1x256xf32, #tpu.memory_space<vmem>>, vector<1x1x256xf32>
    %15 = vector.shape_cast %14 : vector<1x1x256xf32> to vector<1x256xf32>
    %16 = arith.mulf %1, %13 : vector<16x256xf32>
    %cst_11 = arith.constant dense<0.000000e+00> : vector<256xf32>
    %17 = vector.multi_reduction <add>, %16, %cst_11 [0] : vector<16x256xf32> to vector<256xf32>
    %18 = vector.shape_cast %17 : vector<256xf32> to vector<1x256xf32>
    %cst_12 = arith.constant 2.500000e-01 : f32
    %19 = vector.broadcast %cst_12 : f32 to vector<1x256xf32>
    %20 = arith.mulf %18, %19 : vector<1x256xf32>
    %21 = arith.mulf %20, %15 : vector<1x256xf32>
    %c15_i32 = arith.constant 15 : i32
    %22 = tpu.dynamic_rotate %3 by %c15_i32 dim 1 : vector<16x256xf32>, i32 -> vector<16x256xf32>
    %c2 = arith.constant 2 : index
    %c0_13 = arith.constant 0 : index
    %c0_14 = arith.constant 0 : index
    %23 = vector.load %arg1[%c2, %c0_13, %c0_14] : memref<9x1x256xf32, #tpu.memory_space<vmem>>, vector<1x1x256xf32>
    %24 = vector.shape_cast %23 : vector<1x1x256xf32> to vector<1x256xf32>
    %25 = arith.mulf %1, %22 : vector<16x256xf32>
    %cst_15 = arith.constant dense<0.000000e+00> : vector<256xf32>
    %26 = vector.multi_reduction <add>, %25, %cst_15 [0] : vector<16x256xf32> to vector<256xf32>
    %27 = vector.shape_cast %26 : vector<256xf32> to vector<1x256xf32>
    %cst_16 = arith.constant 2.500000e-01 : f32
    %28 = vector.broadcast %cst_16 : f32 to vector<1x256xf32>
    %29 = arith.mulf %27, %28 : vector<1x256xf32>
    %30 = arith.mulf %29, %24 : vector<1x256xf32>
    %c1_i32 = arith.constant 1 : i32
    %31 = tpu.dynamic_rotate %3 by %c1_i32 dim 1 : vector<16x256xf32>, i32 -> vector<16x256xf32>
    %c3 = arith.constant 3 : index
    %c0_17 = arith.constant 0 : index
    %c0_18 = arith.constant 0 : index
    %32 = vector.load %arg1[%c3, %c0_17, %c0_18] : memref<9x1x256xf32, #tpu.memory_space<vmem>>, vector<1x1x256xf32>
    %33 = vector.shape_cast %32 : vector<1x1x256xf32> to vector<1x256xf32>
    %34 = arith.mulf %1, %31 : vector<16x256xf32>
    %cst_19 = arith.constant dense<0.000000e+00> : vector<256xf32>
    %35 = vector.multi_reduction <add>, %34, %cst_19 [0] : vector<16x256xf32> to vector<256xf32>
    %36 = vector.shape_cast %35 : vector<256xf32> to vector<1x256xf32>
    %cst_20 = arith.constant 2.500000e-01 : f32
    %37 = vector.broadcast %cst_20 : f32 to vector<1x256xf32>
    %38 = arith.mulf %36, %37 : vector<1x256xf32>
    %39 = arith.mulf %38, %33 : vector<1x256xf32>
    %c4 = arith.constant 4 : index
    %c0_21 = arith.constant 0 : index
    %c0_22 = arith.constant 0 : index
    %40 = vector.load %arg1[%c4, %c0_21, %c0_22] : memref<9x1x256xf32, #tpu.memory_space<vmem>>, vector<1x1x256xf32>
    %41 = vector.shape_cast %40 : vector<1x1x256xf32> to vector<1x256xf32>
    %42 = arith.mulf %1, %3 : vector<16x256xf32>
    %cst_23 = arith.constant dense<0.000000e+00> : vector<256xf32>
    %43 = vector.multi_reduction <add>, %42, %cst_23 [0] : vector<16x256xf32> to vector<256xf32>
    %44 = vector.shape_cast %43 : vector<256xf32> to vector<1x256xf32>
    %cst_24 = arith.constant 2.500000e-01 : f32
    %45 = vector.broadcast %cst_24 : f32 to vector<1x256xf32>
    %46 = arith.mulf %44, %45 : vector<1x256xf32>
    %47 = arith.mulf %46, %41 : vector<1x256xf32>
    %c255_i32 = arith.constant 255 : i32
    %48 = tpu.dynamic_rotate %3 by %c255_i32 dim 1 : vector<16x256xf32>, i32 -> vector<16x256xf32>
    %c5 = arith.constant 5 : index
    %c0_25 = arith.constant 0 : index
    %c0_26 = arith.constant 0 : index
    %49 = vector.load %arg1[%c5, %c0_25, %c0_26] : memref<9x1x256xf32, #tpu.memory_space<vmem>>, vector<1x1x256xf32>
    %50 = vector.shape_cast %49 : vector<1x1x256xf32> to vector<1x256xf32>
    %51 = arith.mulf %1, %48 : vector<16x256xf32>
    %cst_27 = arith.constant dense<0.000000e+00> : vector<256xf32>
    %52 = vector.multi_reduction <add>, %51, %cst_27 [0] : vector<16x256xf32> to vector<256xf32>
    %53 = vector.shape_cast %52 : vector<256xf32> to vector<1x256xf32>
    %cst_28 = arith.constant 2.500000e-01 : f32
    %54 = vector.broadcast %cst_28 : f32 to vector<1x256xf32>
    %55 = arith.mulf %53, %54 : vector<1x256xf32>
    %56 = arith.mulf %55, %50 : vector<1x256xf32>
    %c241_i32 = arith.constant 241 : i32
    %57 = tpu.dynamic_rotate %3 by %c241_i32 dim 1 : vector<16x256xf32>, i32 -> vector<16x256xf32>
    %c6 = arith.constant 6 : index
    %c0_29 = arith.constant 0 : index
    %c0_30 = arith.constant 0 : index
    %58 = vector.load %arg1[%c6, %c0_29, %c0_30] : memref<9x1x256xf32, #tpu.memory_space<vmem>>, vector<1x1x256xf32>
    %59 = vector.shape_cast %58 : vector<1x1x256xf32> to vector<1x256xf32>
    %60 = arith.mulf %1, %57 : vector<16x256xf32>
    %cst_31 = arith.constant dense<0.000000e+00> : vector<256xf32>
    %61 = vector.multi_reduction <add>, %60, %cst_31 [0] : vector<16x256xf32> to vector<256xf32>
    %62 = vector.shape_cast %61 : vector<256xf32> to vector<1x256xf32>
    %cst_32 = arith.constant 2.500000e-01 : f32
    %63 = vector.broadcast %cst_32 : f32 to vector<1x256xf32>
    %64 = arith.mulf %62, %63 : vector<1x256xf32>
    %65 = arith.mulf %64, %59 : vector<1x256xf32>
    %c240_i32 = arith.constant 240 : i32
    %66 = tpu.dynamic_rotate %3 by %c240_i32 dim 1 : vector<16x256xf32>, i32 -> vector<16x256xf32>
    %c7 = arith.constant 7 : index
    %c0_33 = arith.constant 0 : index
    %c0_34 = arith.constant 0 : index
    %67 = vector.load %arg1[%c7, %c0_33, %c0_34] : memref<9x1x256xf32, #tpu.memory_space<vmem>>, vector<1x1x256xf32>
    %68 = vector.shape_cast %67 : vector<1x1x256xf32> to vector<1x256xf32>
    %69 = arith.mulf %1, %66 : vector<16x256xf32>
    %cst_35 = arith.constant dense<0.000000e+00> : vector<256xf32>
    %70 = vector.multi_reduction <add>, %69, %cst_35 [0] : vector<16x256xf32> to vector<256xf32>
    %71 = vector.shape_cast %70 : vector<256xf32> to vector<1x256xf32>
    %cst_36 = arith.constant 2.500000e-01 : f32
    %72 = vector.broadcast %cst_36 : f32 to vector<1x256xf32>
    %73 = arith.mulf %71, %72 : vector<1x256xf32>
    %74 = arith.mulf %73, %68 : vector<1x256xf32>
    %c239_i32 = arith.constant 239 : i32
    %75 = tpu.dynamic_rotate %3 by %c239_i32 dim 1 : vector<16x256xf32>, i32 -> vector<16x256xf32>
    %c8 = arith.constant 8 : index
    %c0_37 = arith.constant 0 : index
    %c0_38 = arith.constant 0 : index
    %76 = vector.load %arg1[%c8, %c0_37, %c0_38] : memref<9x1x256xf32, #tpu.memory_space<vmem>>, vector<1x1x256xf32>
    %77 = vector.shape_cast %76 : vector<1x1x256xf32> to vector<1x256xf32>
    %78 = arith.mulf %1, %75 : vector<16x256xf32>
    %cst_39 = arith.constant dense<0.000000e+00> : vector<256xf32>
    %79 = vector.multi_reduction <add>, %78, %cst_39 [0] : vector<16x256xf32> to vector<256xf32>
    %80 = vector.shape_cast %79 : vector<256xf32> to vector<1x256xf32>
    %cst_40 = arith.constant 2.500000e-01 : f32
    %81 = vector.broadcast %cst_40 : f32 to vector<1x256xf32>
    %82 = arith.mulf %80, %81 : vector<1x256xf32>
    %83 = arith.mulf %82, %77 : vector<1x256xf32>
    %84 = arith.maximumf %12, %21 : vector<1x256xf32>
    %85 = arith.maximumf %84, %30 : vector<1x256xf32>
    %86 = arith.maximumf %85, %39 : vector<1x256xf32>
    %87 = arith.maximumf %86, %47 : vector<1x256xf32>
    %88 = arith.maximumf %87, %56 : vector<1x256xf32>
    %89 = arith.maximumf %88, %65 : vector<1x256xf32>
    %90 = arith.maximumf %89, %74 : vector<1x256xf32>
    %91 = arith.maximumf %90, %83 : vector<1x256xf32>
    %92 = arith.subf %12, %91 : vector<1x256xf32>
    %93 = math.exp %92 : vector<1x256xf32>
    %94 = arith.subf %21, %91 : vector<1x256xf32>
    %95 = math.exp %94 : vector<1x256xf32>
    %96 = arith.subf %30, %91 : vector<1x256xf32>
    %97 = math.exp %96 : vector<1x256xf32>
    %98 = arith.subf %39, %91 : vector<1x256xf32>
    %99 = math.exp %98 : vector<1x256xf32>
    %100 = arith.subf %47, %91 : vector<1x256xf32>
    %101 = math.exp %100 : vector<1x256xf32>
    %102 = arith.subf %56, %91 : vector<1x256xf32>
    %103 = math.exp %102 : vector<1x256xf32>
    %104 = arith.subf %65, %91 : vector<1x256xf32>
    %105 = math.exp %104 : vector<1x256xf32>
    %106 = arith.subf %74, %91 : vector<1x256xf32>
    %107 = math.exp %106 : vector<1x256xf32>
    %108 = arith.subf %83, %91 : vector<1x256xf32>
    %109 = math.exp %108 : vector<1x256xf32>
    %110 = arith.addf %93, %95 : vector<1x256xf32>
    %111 = arith.addf %110, %97 : vector<1x256xf32>
    %112 = arith.addf %111, %99 : vector<1x256xf32>
    %113 = arith.addf %112, %101 : vector<1x256xf32>
    %114 = arith.addf %113, %103 : vector<1x256xf32>
    %115 = arith.addf %114, %105 : vector<1x256xf32>
    %116 = arith.addf %115, %107 : vector<1x256xf32>
    %117 = arith.addf %116, %109 : vector<1x256xf32>
    %118 = tpu.reciprocal %117 {approx = true} : vector<1x256xf32> -> vector<1x256xf32>
    %c0_41 = arith.constant 0 : index
    %c0_42 = arith.constant 0 : index
    %c0_43 = arith.constant 0 : index
    %119 = vector.load %arg4[%c0_41, %c0_42, %c0_43] : memref<1x16x256xf32, #tpu.memory_space<vmem>>, vector<1x16x256xf32>
    %120 = vector.shape_cast %119 : vector<1x16x256xf32> to vector<16x256xf32>
    %cst_44 = arith.constant 0.000000e+00 : f32
    %121 = vector.broadcast %cst_44 : f32 to vector<16x256xf32>
    %c17_i32_45 = arith.constant 17 : i32
    %122 = tpu.dynamic_rotate %120 by %c17_i32_45 dim 1 : vector<16x256xf32>, i32 -> vector<16x256xf32>
    %123 = arith.mulf %93, %118 : vector<1x256xf32>
    %c0_46 = arith.constant 0 : index
    %c0_47 = arith.constant 0 : index
    %c0_48 = arith.constant 0 : index
    %124 = vector.load %arg1[%c0_46, %c0_47, %c0_48] : memref<9x1x256xf32, #tpu.memory_space<vmem>>, vector<1x1x256xf32>
    %125 = vector.shape_cast %124 : vector<1x1x256xf32> to vector<1x256xf32>
    %126 = arith.mulf %123, %125 : vector<1x256xf32>
    %127 = vector.broadcast %126 : vector<1x256xf32> to vector<16x256xf32>
    %128 = arith.mulf %122, %127 : vector<16x256xf32>
    %129 = arith.addf %121, %128 : vector<16x256xf32>
    %c16_i32_49 = arith.constant 16 : i32
    %130 = tpu.dynamic_rotate %120 by %c16_i32_49 dim 1 : vector<16x256xf32>, i32 -> vector<16x256xf32>
    %131 = arith.mulf %95, %118 : vector<1x256xf32>
    %c1_50 = arith.constant 1 : index
    %c0_51 = arith.constant 0 : index
    %c0_52 = arith.constant 0 : index
    %132 = vector.load %arg1[%c1_50, %c0_51, %c0_52] : memref<9x1x256xf32, #tpu.memory_space<vmem>>, vector<1x1x256xf32>
    %133 = vector.shape_cast %132 : vector<1x1x256xf32> to vector<1x256xf32>
    %134 = arith.mulf %131, %133 : vector<1x256xf32>
    %135 = vector.broadcast %134 : vector<1x256xf32> to vector<16x256xf32>
    %136 = arith.mulf %130, %135 : vector<16x256xf32>
    %137 = arith.addf %129, %136 : vector<16x256xf32>
    %c15_i32_53 = arith.constant 15 : i32
    %138 = tpu.dynamic_rotate %120 by %c15_i32_53 dim 1 : vector<16x256xf32>, i32 -> vector<16x256xf32>
    %139 = arith.mulf %97, %118 : vector<1x256xf32>
    %c2_54 = arith.constant 2 : index
    %c0_55 = arith.constant 0 : index
    %c0_56 = arith.constant 0 : index
    %140 = vector.load %arg1[%c2_54, %c0_55, %c0_56] : memref<9x1x256xf32, #tpu.memory_space<vmem>>, vector<1x1x256xf32>
    %141 = vector.shape_cast %140 : vector<1x1x256xf32> to vector<1x256xf32>
    %142 = arith.mulf %139, %141 : vector<1x256xf32>
    %143 = vector.broadcast %142 : vector<1x256xf32> to vector<16x256xf32>
    %144 = arith.mulf %138, %143 : vector<16x256xf32>
    %145 = arith.addf %137, %144 : vector<16x256xf32>
    %c1_i32_57 = arith.constant 1 : i32
    %146 = tpu.dynamic_rotate %120 by %c1_i32_57 dim 1 : vector<16x256xf32>, i32 -> vector<16x256xf32>
    %147 = arith.mulf %99, %118 : vector<1x256xf32>
    %c3_58 = arith.constant 3 : index
    %c0_59 = arith.constant 0 : index
    %c0_60 = arith.constant 0 : index
    %148 = vector.load %arg1[%c3_58, %c0_59, %c0_60] : memref<9x1x256xf32, #tpu.memory_space<vmem>>, vector<1x1x256xf32>
    %149 = vector.shape_cast %148 : vector<1x1x256xf32> to vector<1x256xf32>
    %150 = arith.mulf %147, %149 : vector<1x256xf32>
    %151 = vector.broadcast %150 : vector<1x256xf32> to vector<16x256xf32>
    %152 = arith.mulf %146, %151 : vector<16x256xf32>
    %153 = arith.addf %145, %152 : vector<16x256xf32>
    %154 = arith.mulf %101, %118 : vector<1x256xf32>
    %c4_61 = arith.constant 4 : index
    %c0_62 = arith.constant 0 : index
    %c0_63 = arith.constant 0 : index
    %155 = vector.load %arg1[%c4_61, %c0_62, %c0_63] : memref<9x1x256xf32, #tpu.memory_space<vmem>>, vector<1x1x256xf32>
    %156 = vector.shape_cast %155 : vector<1x1x256xf32> to vector<1x256xf32>
    %157 = arith.mulf %154, %156 : vector<1x256xf32>
    %158 = vector.broadcast %157 : vector<1x256xf32> to vector<16x256xf32>
    %159 = arith.mulf %120, %158 : vector<16x256xf32>
    %160 = arith.addf %153, %159 : vector<16x256xf32>
    %c255_i32_64 = arith.constant 255 : i32
    %161 = tpu.dynamic_rotate %120 by %c255_i32_64 dim 1 : vector<16x256xf32>, i32 -> vector<16x256xf32>
    %162 = arith.mulf %103, %118 : vector<1x256xf32>
    %c5_65 = arith.constant 5 : index
    %c0_66 = arith.constant 0 : index
    %c0_67 = arith.constant 0 : index
    %163 = vector.load %arg1[%c5_65, %c0_66, %c0_67] : memref<9x1x256xf32, #tpu.memory_space<vmem>>, vector<1x1x256xf32>
    %164 = vector.shape_cast %163 : vector<1x1x256xf32> to vector<1x256xf32>
    %165 = arith.mulf %162, %164 : vector<1x256xf32>
    %166 = vector.broadcast %165 : vector<1x256xf32> to vector<16x256xf32>
    %167 = arith.mulf %161, %166 : vector<16x256xf32>
    %168 = arith.addf %160, %167 : vector<16x256xf32>
    %c241_i32_68 = arith.constant 241 : i32
    %169 = tpu.dynamic_rotate %120 by %c241_i32_68 dim 1 : vector<16x256xf32>, i32 -> vector<16x256xf32>
    %170 = arith.mulf %105, %118 : vector<1x256xf32>
    %c6_69 = arith.constant 6 : index
    %c0_70 = arith.constant 0 : index
    %c0_71 = arith.constant 0 : index
    %171 = vector.load %arg1[%c6_69, %c0_70, %c0_71] : memref<9x1x256xf32, #tpu.memory_space<vmem>>, vector<1x1x256xf32>
    %172 = vector.shape_cast %171 : vector<1x1x256xf32> to vector<1x256xf32>
    %173 = arith.mulf %170, %172 : vector<1x256xf32>
    %174 = vector.broadcast %173 : vector<1x256xf32> to vector<16x256xf32>
    %175 = arith.mulf %169, %174 : vector<16x256xf32>
    %176 = arith.addf %168, %175 : vector<16x256xf32>
    %c240_i32_72 = arith.constant 240 : i32
    %177 = tpu.dynamic_rotate %120 by %c240_i32_72 dim 1 : vector<16x256xf32>, i32 -> vector<16x256xf32>
    %178 = arith.mulf %107, %118 : vector<1x256xf32>
    %c7_73 = arith.constant 7 : index
    %c0_74 = arith.constant 0 : index
    %c0_75 = arith.constant 0 : index
    %179 = vector.load %arg1[%c7_73, %c0_74, %c0_75] : memref<9x1x256xf32, #tpu.memory_space<vmem>>, vector<1x1x256xf32>
    %180 = vector.shape_cast %179 : vector<1x1x256xf32> to vector<1x256xf32>
    %181 = arith.mulf %178, %180 : vector<1x256xf32>
    %182 = vector.broadcast %181 : vector<1x256xf32> to vector<16x256xf32>
    %183 = arith.mulf %177, %182 : vector<16x256xf32>
    %184 = arith.addf %176, %183 : vector<16x256xf32>
    %c239_i32_76 = arith.constant 239 : i32
    %185 = tpu.dynamic_rotate %120 by %c239_i32_76 dim 1 : vector<16x256xf32>, i32 -> vector<16x256xf32>
    %186 = arith.mulf %109, %118 : vector<1x256xf32>
    %c8_77 = arith.constant 8 : index
    %c0_78 = arith.constant 0 : index
    %c0_79 = arith.constant 0 : index
    %187 = vector.load %arg1[%c8_77, %c0_78, %c0_79] : memref<9x1x256xf32, #tpu.memory_space<vmem>>, vector<1x1x256xf32>
    %188 = vector.shape_cast %187 : vector<1x1x256xf32> to vector<1x256xf32>
    %189 = arith.mulf %186, %188 : vector<1x256xf32>
    %190 = vector.broadcast %189 : vector<1x256xf32> to vector<16x256xf32>
    %191 = arith.mulf %185, %190 : vector<16x256xf32>
    %192 = arith.addf %184, %191 : vector<16x256xf32>
    %c0_80 = arith.constant 0 : index
    %c0_81 = arith.constant 0 : index
    %c0_82 = arith.constant 0 : index
    %193 = vector.load %arg5[%c0_80, %c0_81, %c0_82] : memref<1x16x256xf32, #tpu.memory_space<vmem>>, vector<1x16x256xf32>
    %194 = vector.shape_cast %193 : vector<1x16x256xf32> to vector<16x256xf32>
    %195 = vector.shape_cast %192 : vector<16x256xf32> to vector<1x16x256xf32>
    tpu.vector_store %arg5[%c0_80, %c0_81, %c0_82], %195 {strides = array<i32>} : memref<1x16x256xf32, #tpu.memory_space<vmem>>, vector<1x16x256xf32>,
    return
  }
  func.func @transform_0(%arg0: i32) -> (i32, i32, i32) {
    %c0_i32 = arith.constant 0 : i32
    %c0_i32_0 = arith.constant 0 : i32
    %c0_i32_1 = arith.constant 0 : i32
    %c0_i32_2 = arith.constant 0 : i32
    return %c0_i32, %c0_i32_0, %c0_i32_1 : i32, i32, i32
  }
  func.func @transform_1(%arg0: i32) -> (i32, i32, i32) {
    %c0_i32 = arith.constant 0 : i32
    %c0_i32_0 = arith.constant 0 : i32
    %c0_i32_1 = arith.constant 0 : i32
    return %arg0, %c0_i32, %c0_i32_0 : i32, i32, i32
  }
  func.func @transform_2(%arg0: i32) -> (i32, i32, i32) {
    %c0_i32 = arith.constant 0 : i32
    %c0_i32_0 = arith.constant 0 : i32
    %c0_i32_1 = arith.constant 0 : i32
    return %arg0, %c0_i32, %c0_i32_0 : i32, i32, i32
  }
  func.func @transform_3(%arg0: i32) -> (i32, i32, i32) {
    %c0_i32 = arith.constant 0 : i32
    %c0_i32_0 = arith.constant 0 : i32
    %c0_i32_1 = arith.constant 0 : i32
    return %arg0, %c0_i32, %c0_i32_0 : i32, i32, i32
  }
  func.func @transform_4(%arg0: i32) -> (i32, i32, i32) {
    %c0_i32 = arith.constant 0 : i32
    %c0_i32_0 = arith.constant 0 : i32
    %c0_i32_1 = arith.constant 0 : i32
    return %arg0, %c0_i32, %c0_i32_0 : i32, i32, i32
  }
}

</mosaic_0001>

<bundles_post_ra>
// kernel: tpu_custom_call.1
= control target key start
LH: loop header
LB: loop body
LE: loop exit
PB: predicated region body
PF: predicated region fallthrough
CT: control target
= control target key end

     0   :  { %s2532_s0 = inlined_call_operand.hbm [shape: f32[9,1,256], index: 0, kind: input, shape index: {}]   ;;  %s2533_s1 = inlined_call_operand.hbm [shape: f32[2,16,256], index: 1, kind: input, shape index: {}]   ;;  %s2534_s2 = inlined_call_operand.hbm [shape: f32[2,16,256], index: 2, kind: input, shape index: {}]   ;;  %s2535_s3 = inlined_call_operand.hbm [shape: f32[2,16,256], index: 3, kind: input, shape index: {}]   ;;  %s2536_s4 = inlined_call_operand.hbm [shape: f32[2,16,256], index: 4, kind: output, shape index: {}]  }
   0x1   :  { %2555 = sst [smem:[#allocation28_spill]] %s2533_s1 }
   0x2   :  { %2556 = sst [smem:[#allocation29_spill]] %s2534_s2 }
   0x3   :  { %9 = vsyncpa [#allocation3], 0 }
   0x4   :  { %10 = vsyncpa [#allocation6], 0 }
   0x5   :  { %12 = vsyncpa [#allocation6 + $0x1], 0 }
   0x6   :  { %13 = vsyncpa [#allocation9], 0 }
   0x7   :  { %15 = vsyncpa [#allocation9 + $0x1], 0 }
   0x8   :  { %16 = vsyncpa [#allocation4], 0 }
   0x9   :  { %18 = vsyncpa [#allocation4 + $0x1], 0  ;;  %s1629_s15 = smov 0   ;;  %s1631_s16 = smov 0  }
   0xa   :  { %s1633_s17 = smov 0   ;;  %s1635_s18 = smov 0  }
   0xb LB: > { %2557 = sst [smem:[#allocation15_spill]] %s1584_s18  ;;  %s1650_s19 = sadd.s32 1, %s1584_s18   ;;  %s1584_s18 = sphi %s1635_s18, %s2602_s18   ;;  %s1580_s17 = sphi %s1633_s17, %s2606_s17   ;;  %s1576_s16 = sphi %s1631_s16, %s2605_s16   ;;  %s1572_s15 = sphi %s1629_s15, %s2604_s15  }
   0xc   : > { %2558 = sst [smem:[#allocation16_spill]] %s1650_s19  ;;  %s52_s20 = sadd.s32 1, %s1580_s17 }
   0xd   : > { %s49_s21 = ssub.s32 %s1584_s18, %s1650_s19  ;;  %p2537_p0 = scmp.ne.s32.totalorder %s1580_s17, %s1576_s16 }
   0xe   : > { %p50_p1 = scmp.eq.s32.totalorder %s49_s21, 0  ;;  %p60_p2 = scmp.eq.s32.totalorder %s1584_s18, 0 }
   0xf   : > { %p1309_p4 = scmp.lt.s32.totalorder %s1584_s18, 2  ;;  %s180_s23 = sand.u32 1, %s1584_s18  }
  0x10   : > { %s1661_s22 = scalar_select %p50_p1, %s1580_s17, %s52_s20  }
  0x11   : > { %p61_p5 = por %p60_p2, %p2537_p0  ;;  %s2538_s24 = sand.u32 1, %s1580_s17  }
  0x12   : > { %2559 = sst [smem:[#allocation17_spill]] %s1661_s22  ;;  %s1670_s25 = sshll.u32 %s2538_s24, 5 }
  0x13   : > { %s1673_s26 = sshll.u32 %s1584_s18, 9  ;;  %s2560_s1 = sld [smem:[#allocation28_spill]] }
  0x14   : > { %s184_s30 = scalar_lea.vmem [#allocation5], %s1670_s25  ;;  %p1682_p6 = pnand %p1309_p4, %p61_p5 }
  0x15   : > { %s191_s5 = sshll.u32 %s184_s30, 4  ;;  %s1688_s7 = scalar_lea.sflag [#allocation6], %s180_s23  ;;  %s1686_s5 = int_to_ptr.vmem [resolvable:$true] %s191_s5 }
  0x16   : > { %p1694_p8 = pneg %p1682_p6 }
  0x19   : > { %s1679_s29 = scalar_lea.hbm %s2560_s1, %s1673_s26  ;;  %s1407_s12 = scalar_lea.hbm %s2560_s1, 1024 }
  0x1a   : > { %s1402_s8 = scalar_lea.hbm %s1679_s29, 512  ;;  %p1408_p11 = scmp.lt.s32.totalorder %s1679_s29, %s2560_s1 }
  0x1b   : > { %p1403_p7 = scmp.ne.s32.totalorder %s1679_s29, %s1402_s8  ;;  %p1409_p12 = scmp.lt.s32.totalorder %s1407_s12, %s1402_s8 }
  0x1d   : > { %p1405_p9 = pnand %p1694_p8, %p1403_p7  ;;  %p1410_p13 = por %p1409_p12, %p1408_p11 }
  0x1f   : > { %p1406_p10 = pneg %p1405_p9 }
  0x21   : > { %p1411_p1 = pnand %p1410_p13, %p1406_p10 }
  0x23   : > { %1414 = shalt.err (!%p1411_p1)
}
  0x24   : > { %s1415_s20 = scalar_lea.vmem %s1686_s5, 512  ;;  %s1586_s21 = smov [#allocation5]  }
  0x25   : > { %p1416_p2 = scmp.ne.s32.totalorder %s1686_s5, %s1415_s20  ;;  %s1420_s23 = sshll.u32 %s1586_s21, 4  ;;  %s1421_s23 = int_to_ptr.vmem [resolvable:$false] %s1420_s23 }
  0x26   : > { %s1422_s27 = scalar_lea.vmem %s1421_s23, 1024  ;;  %p1423_p7 = scmp.lt.s32.totalorder %s1686_s5, %s1421_s23 }
  0x27   : > { %p1418_p4 = pnand %p1416_p2, %p1694_p8  ;;  %p1424_p9 = scmp.lt.s32.totalorder %s1422_s27, %s1415_s20 }
  0x29   : > { %p1419_p5 = pneg %p1418_p4  ;;  %p1425_p3 = por %p1424_p9, %p1423_p7 }
  0x2b   : > { %p1426_p0 = pnand %p1425_p3, %p1419_p5 }
  0x2d   : > { %1429 = shalt.err (!%p1426_p0)
}
  0x2e   : > { %s2539_s28 = smov 256   ;;  %s2541_s30 = smov 16  }
  0x2f   : > { %1297 = dma.hbm_to_vmem [thread:$0]  (!%p1682_p6), %s1679_s29, 512, %s1686_s5, %s1688_s7, %s2539_s28, %s2539_s28, %s2541_s30  }
  0x30   : > { %s1721_s8 = sadd.s32 4294967295, %s1584_s18   ;;  %s1250_s10 = sadd.s32 4294967294, %s1584_s18  }
  0x31   : > { %p65_p0 = scmp.ne.s32.totalorder %s1576_s16, %s1572_s15  ;;  %p2543_p3 = scmp.eq.s32.totalorder %s1721_s8, 0 }
  0x32   : > { %p141_p10 = scmp.eq.s32.totalorder %s1721_s8, 1  ;;  %p147_p11 = scmp.eq.s32.totalorder %s1250_s10, 1 }
  0x33   : > { %p1730_p12 = por %p2543_p3, %p65_p0  ;;  %p1251_p13 = scmp.ge.s32.totalorder %s1584_s18, 1 }
  0x34   : > { %p2564_p1 = scmp.ne.s32.totalorder %s1580_s17, %s1576_s16  ;;  %p1742_p4 = por %p147_p11, %p65_p0 }
  0x35   : > { %s2563_s11 = scalar_select %p1730_p12, 1, 0 }
  0x36   : > { %p1738_p2 = por %p141_p10, %p2564_p1  ;;  %p154_p5 = scmp.lt.s32.totalorder %s1584_s18, 3 }
  0x37   : > { %s2566_s5 = scalar_select %p1742_p4, 1, 0 }
  0x38   : > { %s2565_s29 = scalar_select %p1738_p2, 1, 0 }
  0x39   : > { %p1747_p7 = pnand %p1251_p13, %p154_p5  ;;  %s1589_s13 = smov [#allocation2]  }
  0x3a   : > { %s166_s14 = sshll.u32 %s1589_s13, 4  ;;  %s2568_s2 = sld [smem:[#allocation29_spill]]  ;;  %s1751_s14 = int_to_ptr.vmem [resolvable:$true] %s166_s14 }
  0x3b   : > { %s2567_s12 = scalar_select %p1747_p7, 1, 0 }
  0x3c   : > { %p1290_p9 = pneg %p1747_p7  ;;  %s205_s27 = scalar_lea.vmem [#allocation7], %s1670_s25 }
  0x3d   : > { %s212_s10 = sshll.u32 %s205_s27, 4  ;;  %s213_s10 = int_to_ptr.vmem [resolvable:$true] %s212_s10 }
  0x3e   : > { %p1764_p0 = pnand %p1290_p9, %p2543_p3 }
  0x40   : > { %s1759_s23 = scalar_lea.hbm %s2568_s2, %s1673_s26  ;;  %s1435_s21 = scalar_lea.hbm %s2568_s2, 1024 }
  0x41   : > { %s2569_s24 = scalar_select %p1764_p0, 1, 0 }
  0x42   : > { %s1430_s13 = scalar_lea.hbm %s1759_s23, 512  ;;  %p1436_p1 = scmp.lt.s32.totalorder %s1759_s23, %s2568_s2 }
  0x43   : > { %p1431_p10 = scmp.ne.s32.totalorder %s1759_s23, %s1430_s13  ;;  %p1437_p5 = scmp.lt.s32.totalorder %s1435_s21, %s1430_s13 }
  0x45   : > { %p1433_p11 = pnand %p1431_p10, %p1694_p8  ;;  %p1438_p4 = por %p1437_p5, %p1436_p1 }
  0x47   : > { %p1434_p13 = pneg %p1433_p11 }
  0x49   : > { %p1439_p9 = pnand %p1438_p4, %p1434_p13 }
  0x4b   : > { %1442 = shalt.err (!%p1439_p9)
}
  0x4c   : > { %s1443_s27 = scalar_lea.vmem %s213_s10, 512  ;;  %s1590_s22 = smov [#allocation7]  }
  0x4d   : > { %p1444_p3 = scmp.ne.s32.totalorder %s213_s10, %s1443_s27  ;;  %s1448_s19 = sshll.u32 %s1590_s22, 4  ;;  %s1449_s19 = int_to_ptr.vmem [resolvable:$false] %s1448_s19 }
  0x4e   : > { %s1450_s18 = scalar_lea.vmem %s1449_s19, 1024  ;;  %p1451_p10 = scmp.lt.s32.totalorder %s213_s10, %s1449_s19 }
  0x4f   : > { %p1446_p2 = pnand %p1444_p3, %p1694_p8  ;;  %p1452_p11 = scmp.lt.s32.totalorder %s1450_s18, %s1443_s27 }
  0x51   : > { %p1447_p12 = pneg %p1446_p2  ;;  %p1453_p7 = por %p1452_p11, %p1451_p10 }
  0x53   : > { %p1454_p0 = pnand %p1453_p7, %p1447_p12 }
  0x55   : > { %1457 = shalt.err (!%p1454_p0)
}
  0x56   : > { %s2570_s1 = smov 16   ;;  %s2571_s28 = smov 256  }
  0x57   : > { %1300 = dma.hbm_to_vmem [thread:$0]  (!%p1682_p6), %s1759_s23, 512, %s213_s10, %s1688_s7, %s2571_s28, %s2571_s28, %s2570_s1  }
  0x58   : > { %p2572_p3 = scmp.ne.s32.totalorder %s2569_s24, 0  ;;  %s1469_s22 = scalar_lea.vmem %s1751_s14, 288 }
  0x59   : > { %p1470_p4 = scmp.ne.s32.totalorder %s1751_s14, %s1469_s22  ;;  %p1477_p12 = scmp.lt.s32.totalorder %s1751_s14, %s1751_s14 }
  0x5a   : > { %p1460_p2 = pneg %p2572_p3  ;;  %p1478_p7 = scmp.lt.s32.totalorder %s1469_s22, %s1469_s22 }
  0x5c   : > { %p1472_p13 = pnand %p1470_p4, %p1460_p2  ;;  %p1479_p0 = por %p1478_p7, %p1477_p12 }
  0x5e   : > { %p1473_p1 = pneg %p1472_p13 }
  0x60   : > { %p1480_p5 = pnand %p1479_p0, %p1473_p1 }
  0x62   : > { %1483 = shalt.err (!%p1480_p5)
}
  0x63   : > { %s1591_s18 = smov 32   ;;  %s1592_s19 = smov 2  }
  0x64   : > { %1293 = dma.hbm_to_vmem [thread:$0]  (!%p2572_p3), %s2532_s0, 288, %s1751_s14, [#allocation3], %s1591_s18, %s1591_s18, %s1592_s19  }
  0x65   : > { %s1804_s13 = scalar_lea.hbm %s2535_s3, %s1673_s26  ;;  %s226_s20 = scalar_lea.vmem [#allocation8], %s1670_s25 }
  0x66   : > { %s233_s21 = sshll.u32 %s226_s20, 4  ;;  %s2573_s27 = sand.u32 1, %s1580_s17   ;;  %s1807_s21 = int_to_ptr.vmem [resolvable:$true] %s233_s21 }
  0x67   : > { %s223_s22 = scalar_lea.sflag [#allocation9], %s2573_s27  ;;  %s1484_s2 = scalar_lea.hbm %s1804_s13, 512 }
  0x68   : > { %p1485_p9 = scmp.ne.s32.totalorder %s1804_s13, %s1484_s2  ;;  %s1489_s18 = scalar_lea.hbm %s2535_s3, 1024 }
  0x69   : > { %p1490_p3 = scmp.lt.s32.totalorder %s1804_s13, %s2535_s3  ;;  %p1491_p2 = scmp.lt.s32.totalorder %s1489_s18, %s1484_s2 }
  0x6a   : > { %p1487_p10 = pnand %p1485_p9, %p1694_p8 }
  0x6b   : > { %p1492_p4 = por %p1491_p2, %p1490_p3 }
  0x6c   : > { %p1488_p11 = pneg %p1487_p10 }
  0x6e   : > { %p1493_p13 = pnand %p1492_p4, %p1488_p11 }
  0x70   : > { %1496 = shalt.err (!%p1493_p13)
}
  0x71   : > { %s1497_s25 = scalar_lea.vmem %s1807_s21, 512  ;;  %s1593_s7 = smov [#allocation8]  }
  0x72   : > { %p1498_p1 = scmp.ne.s32.totalorder %s1807_s21, %s1497_s25  ;;  %s1502_s30 = sshll.u32 %s1593_s7, 4  ;;  %s1503_s30 = int_to_ptr.vmem [resolvable:$false] %s1502_s30 }
  0x73   : > { %s1504_s23 = scalar_lea.vmem %s1503_s30, 1024  ;;  %p1505_p0 = scmp.lt.s32.totalorder %s1807_s21, %s1503_s30 }
  0x74   : > { %p1500_p12 = pnand %p1498_p1, %p1694_p8  ;;  %p1506_p5 = scmp.lt.s32.totalorder %s1504_s23, %s1497_s25 }
  0x76   : > { %p1501_p7 = pneg %p1500_p12  ;;  %p1507_p9 = por %p1506_p5, %p1505_p0 }
  0x78   : > { %p1508_p10 = pnand %p1507_p9, %p1501_p7 }
  0x7a   : > { %1511 = shalt.err (!%p1508_p10)
}
  0x7b   : > { %1303 = dma.hbm_to_vmem [thread:$0]  (!%p1682_p6), %s1804_s13, 512, %s1807_s21, %s223_s22, %s2571_s28, %s2571_s28, %s2570_s1  }
  0x7c   : > { %p2574_p8 = scmp.ne.s32.totalorder %s2567_s12, 0 }
  0x7e   : > { %245 = sbr.rel (%p2574_p8) target bundleno = 443 (0x1bb), region = 36 }
  0x83   : > { %p2575_p11 = scmp.eq.s32.totalorder %s1721_s8, 0 }
  0x85   : > { %1555 = dma.done.wait (%p2575_p11), [#allocation3], 288   ;;  %p2576_p3 = pmov %p2575_p11 }
  0x86   : > { %s251_s2 = sand.u32 1, %s1721_s8   ;;  %s1842_s6 = sand.u32 1, %s1576_s16  }
  0x87   : > { %1557 = vsyncadd (%p2576_p3), [#allocation3], 4294967008  ;;  %s1845_s9 = sshll.u32 %s1842_s6, 5  ;;  %s252_s1 = scalar_lea.sflag [#allocation6], %s251_s2 }
  0x88   : > { %s1848_s28 = scalar_lea.vmem [#allocation5], %s1845_s9  ;;  %p2577_p6 = scmp.ne.s32.totalorder %s2563_s11, 0 }
  0x8a   : > { %1559 = dma.done.wait (%p2577_p6), %s252_s1, 1024  }
  0x8b   : > { %1561 = vsyncadd (%p2577_p6), %s252_s1, 4294966272  ;;  %s264_s12 = scalar_lea.vmem [#allocation7], %s1845_s9  ;;  %s270_s10 = scalar_lea.sflag [#allocation9], %s1842_s6 }
  0x8c   : > { %s1857_s13 = scalar_lea.vmem [#allocation8], %s1845_s9 }
  0x8d   : > { %1563 = dma.done.wait (%p2577_p6), %s270_s10, 512  }
  0x8e   : > { %1565 = vsyncadd (%p2577_p6), %s270_s10, 4294966784  ;;  %v313_v0 = vld [vmem:[%s264_s12 + $0x8] sm:$0xff]  ;;  %v312_v1 = vld [vmem:[%s264_s12] sm:$0xff]  ;;  %s1594_s20 = smov 17   ;;  %s1595_s21 = smov 16   ;;  %v324_v18 = vlaneseq }
  0x8f   : > { %320 = vrot.lane.b32.xlu1 %v313_v0, %s1594_s20  ;;  %316 = vrot.lane.b32.xlu0 %v312_v1, %s1594_s20  ;;  %v315_v2 = vld [vmem:[%s264_s12 + $0x18] sm:$0xff]  ;;  %v314_v3 = vld [vmem:[%s264_s12 + $0x10] sm:$0xff]  ;;  %s1596_s11 = smov 15   ;;  %s1597_s27 = smov 1  }
  0x90   : > { %v1874_v4 = vld [vmem:[%s1848_s28] sm:$0xff]  ;;  %v1877_v5 = vld [vmem:[%s1848_s28 + $0x8] sm:$0xff]  ;;  %v1880_v6 = vld [vmem:[%s1848_s28 + $0x10] sm:$0xff]  ;;  %s1598_s22 = smov 127   ;;  %s1599_s24 = smov 113   ;;  %v1945_v21 = vand.u32 127, %v324_v18 }
  0x91   : > { %v1885_v7 = vld [vmem:[%s1848_s28 + $0x18] sm:$0xff]  ;;  %v511_v8 = vmul.f32 %v312_v1, %v1874_v4  ;;  %v512_v9 = vmul.f32 %v313_v0, %v1877_v5  ;;  %v513_v10 = vmul.f32 %v314_v3, %v1880_v6  ;;  %s1600_s14 = smov 112   ;;  %s1601_s18 = smov 111   ;;  %v826_v14 = vld [vmem:[%s1857_s13 + $0x10] sm:$0xff]  ;;  %v824_v15 = vld [vmem:[%s1857_s13] sm:$0xff]  ;;  %v354_v52 = vshrl.u32 %v324_v18, 7 }
  0x92   : > { %v514_v11 = vmul.f32 %v315_v2, %v1885_v7  ;;  %v827_v16 = vld [vmem:[%s1857_s13 + $0x18] sm:$0xff]  ;;  %v825_v17 = vld [vmem:[%s1857_s13 + $0x8] sm:$0xff]  ;;  %vm326_vm0 = vcmp.lt.s32.totalorder %v1945_v21, 17  ;;  %vm373_vm1 = vcmp.lt.s32.totalorder %v1945_v21, 16  ;;  %vm421_vm2 = vcmp.lt.s32.totalorder %v1945_v21, 15  ;;  %s307_s26 = scalar_lea.vmem [#allocation10], %s1845_s9 }
  0x93   : > { %322 = vrot.lane.b32.xlu1 %v315_v2, %s1594_s20  ;;  %318 = vrot.lane.b32.xlu0 %v314_v3, %s1594_s20  ;;  %v1891_v12 = vadd.f32 %v513_v10, %v511_v8  ;;  %v1984_v61 = vsub.s32 0, %v354_v52  ;;  %v1986_v62 = vsub.s32 1, %v354_v52  ;;  %vm469_vm3 = vcmp.lt.s32.totalorder %v1945_v21, 1  ;;  %s1122_s19 = sshll.u32 %s307_s26, 4  ;;  %s1277_s25 = sshll.u32 %s1721_s8, 9  ;;  %s2483_s19 = int_to_ptr.vmem [resolvable:$true] %s1122_s19 }
  0x94   : > { %v1893_v13 = vadd.f32 %v514_v11, %v512_v9  ;;  %v331_v11 = vld [vmem:[#allocation2] sm:$0x3]  ;;  %vm552_vm4 = vcmp.lt.s32.totalorder %v1945_v21, 127  ;;  %vm600_vm5 = vcmp.lt.s32.totalorder %v1945_v21, 113  ;;  %vm648_vm6 = vcmp.lt.s32.totalorder %v1945_v21, 112  ;;  %s2488_s23 = scalar_lea.hbm %s2536_s4, %s1277_s25  ;;  %s1109_s8 = scalar_lea.sflag [#allocation4], %s1842_s6 }
  0x95   : > { %v516_v28 = vrot.slane %v1891_v12, 4  ;;  %vm696_vm7 = vcmp.lt.s32.totalorder %v1945_v21, 111  ;;  %s1512_s2 = scalar_lea.vmem %s2483_s19, 512  ;;  %p2598_p4 = scmp.ne.s32.totalorder %s2565_s29, 0 }
  0x96   : > { %v523_v29 = vrot.slane %v1893_v13, 4  ;;  %p1513_p2 = scmp.ne.s32.totalorder %s2483_s19, %s1512_s2  ;;  %s1602_s9 = smov [#allocation10]  }
  0x97   : > { %367 = vrot.lane.b32.xlu1 %v314_v3, %s1595_s21  ;;  %365 = vrot.lane.b32.xlu0 %v312_v1, %s1595_s21  ;;  %v517_v38 = vadd.f32 %v516_v28, %v1891_v12  ;;  %s1516_s1 = sshll.u32 %s1602_s9, 4  ;;  %s1517_s1 = int_to_ptr.vmem [resolvable:$false] %s1516_s1 }
  0x98   : > { %v524_v39 = vadd.f32 %v523_v29, %v1893_v13  ;;  %p1514_p13 = pnand %p1513_p2, %p2598_p4  ;;  %s1518_s28 = scalar_lea.vmem %s1517_s1, 1024 }
  0x99   : > { %v518_v53 = vrot.slane %v517_v38, 2  ;;  %p1519_p12 = scmp.lt.s32.totalorder %s2483_s19, %s1517_s1  ;;  %p1520_p7 = scmp.lt.s32.totalorder %s1518_s28, %s1512_s2 }
  0x9a   : > { %v525_v54 = vrot.slane %v524_v39, 2  ;;  %p1515_p1 = pneg %p1514_p13 }
  0x9b   : > { %371 = vrot.lane.b32.xlu1 %v315_v2, %s1595_s21  ;;  %369 = vrot.lane.b32.xlu0 %v313_v0, %s1595_s21  ;;  %p1521_p0 = por %p1520_p7, %p1519_p12 }
  0x9d   : > { %p1522_p5 = pnand %p1521_p0, %p1515_p1 }
  0x9f   : > { %415 = vrot.lane.b32.xlu1 %v314_v3, %s1596_s11  ;;  %413 = vrot.lane.b32.xlu0 %v312_v1, %s1596_s11 }
  0xa3   : > { %419 = vrot.lane.b32.xlu1 %v315_v2, %s1596_s11  ;;  %417 = vrot.lane.b32.xlu0 %v313_v0, %s1596_s11 }
  0xa7   : > { %463 = vrot.lane.b32.xlu1 %v314_v3, %s1597_s27  ;;  %461 = vrot.lane.b32.xlu0 %v312_v1, %s1597_s27 }
  0xab   : > { %467 = vrot.lane.b32.xlu1 %v315_v2, %s1597_s27  ;;  %465 = vrot.lane.b32.xlu0 %v313_v0, %s1597_s27 }
  0xaf   : > { %546 = vrot.lane.b32.xlu1 %v314_v3, %s1598_s22  ;;  %544 = vrot.lane.b32.xlu0 %v312_v1, %s1598_s22 }
  0xb3   : > { %550 = vrot.lane.b32.xlu1 %v315_v2, %s1598_s22  ;;  %548 = vrot.lane.b32.xlu0 %v313_v0, %s1598_s22 }
  0xb7   : > { %594 = vrot.lane.b32.xlu1 %v314_v3, %s1599_s24  ;;  %592 = vrot.lane.b32.xlu0 %v312_v1, %s1599_s24 }
  0xbb   : > { %598 = vrot.lane.b32.xlu1 %v315_v2, %s1599_s24  ;;  %596 = vrot.lane.b32.xlu0 %v313_v0, %s1599_s24 }
  0xbf   : > { %642 = vrot.lane.b32.xlu1 %v314_v3, %s1600_s14  ;;  %640 = vrot.lane.b32.xlu0 %v312_v1, %s1600_s14 }
  0xc3   : > { %646 = vrot.lane.b32.xlu1 %v315_v2, %s1600_s14  ;;  %644 = vrot.lane.b32.xlu0 %v313_v0, %s1600_s14 }
  0xc7   : > { %690 = vrot.lane.b32.xlu1 %v314_v3, %s1601_s18  ;;  %688 = vrot.lane.b32.xlu0 %v312_v1, %s1601_s18  ;;  %v519_v1 = vadd.f32 %v518_v53, %v517_v38 }
  0xcb   : > { %694 = vrot.lane.b32.xlu1 %v315_v2, %s1601_s18  ;;  %692 = vrot.lane.b32.xlu0 %v313_v0, %s1601_s18  ;;  %v526_v2 = vadd.f32 %v525_v54, %v524_v39 }
  0xcf   : > { %830 = vrot.lane.b32.xlu1 %v826_v14, %s1594_s20  ;;  %828 = vrot.lane.b32.xlu0 %v824_v15, %s1594_s20 }
  0xd3   : > { %834 = vrot.lane.b32.xlu1 %v827_v16, %s1594_s20  ;;  %832 = vrot.lane.b32.xlu0 %v825_v17, %s1594_s20 }
  0xd7   : > { %862 = vrot.lane.b32.xlu1 %v826_v14, %s1595_s21  ;;  %860 = vrot.lane.b32.xlu0 %v824_v15, %s1595_s21 }
  0xdb   : > { %866 = vrot.lane.b32.xlu1 %v827_v16, %s1595_s21  ;;  %864 = vrot.lane.b32.xlu0 %v825_v17, %s1595_s21 }
  0xdf   : > { %894 = vrot.lane.b32.xlu1 %v826_v14, %s1596_s11  ;;  %892 = vrot.lane.b32.xlu0 %v824_v15, %s1596_s11 }
  0xe3   : > { %898 = vrot.lane.b32.xlu1 %v827_v16, %s1596_s11  ;;  %896 = vrot.lane.b32.xlu0 %v825_v17, %s1596_s11 }
  0xe7   : > { %926 = vrot.lane.b32.xlu1 %v826_v14, %s1597_s27  ;;  %924 = vrot.lane.b32.xlu0 %v824_v15, %s1597_s27 }
  0xeb   : > { %930 = vrot.lane.b32.xlu1 %v827_v16, %s1597_s27  ;;  %928 = vrot.lane.b32.xlu0 %v825_v17, %s1597_s27 }
  0xef   : > { %978 = vrot.lane.b32.xlu1 %v826_v14, %s1598_s22  ;;  %976 = vrot.lane.b32.xlu0 %v824_v15, %s1598_s22 }
  0xf3   : > { %982 = vrot.lane.b32.xlu1 %v827_v16, %s1598_s22  ;;  %980 = vrot.lane.b32.xlu0 %v825_v17, %s1598_s22 }
  0xf7   : > { %1010 = vrot.lane.b32.xlu1 %v826_v14, %s1599_s24  ;;  %1008 = vrot.lane.b32.xlu0 %v824_v15, %s1599_s24 }
  0xfb   : > { %1014 = vrot.lane.b32.xlu1 %v827_v16, %s1599_s24  ;;  %1012 = vrot.lane.b32.xlu0 %v825_v17, %s1599_s24 }
  0xff   : > { %1042 = vrot.lane.b32.xlu1 %v826_v14, %s1600_s14  ;;  %1040 = vrot.lane.b32.xlu0 %v824_v15, %s1600_s14 }
 0x101   : > { %v321_v19 = vpop.permute.xlu1 %320  ;;  %v317_v20 = vpop.permute.xlu0 %316 }
 0x102   : > { %v327_v30 = vsel %vm326_vm0, %v317_v20, %v321_v19  ;;  %v329_v31 = vsel %vm326_vm0, %v321_v19, %v317_v20  ;;  %v379_v20 = vld [vmem:[#allocation2 + $0x2] sm:$0x3] }
 0x103   : > { %1046 = vrot.lane.b32.xlu1 %v827_v16, %s1600_s14  ;;  %1044 = vrot.lane.b32.xlu0 %v825_v17, %s1600_s14  ;;  %v332_v34 = vmul.f32 %v329_v31, %v1874_v4  ;;  %v333_v35 = vmul.f32 %v327_v30, %v1877_v5  ;;  %v2005_v31 = vrot.slane %v331_v11, %v1986_v62 }
 0x105   : > { %v323_v22 = vpop.permute.xlu1 %322  ;;  %v319_v23 = vpop.permute.xlu0 %318 }
 0x106   : > { %v328_v24 = vsel %vm326_vm0, %v319_v23, %v323_v22  ;;  %v330_v25 = vsel %vm326_vm0, %v323_v22, %v319_v23  ;;  %v2002_v22 = vrot.slane %v331_v11, %v1984_v61  ;;  %v520_v23 = vrot.slane %v519_v1, 1 }
 0x107   : > { %1074 = vrot.lane.b32.xlu1 %v826_v14, %s1601_s18  ;;  %1072 = vrot.lane.b32.xlu0 %v824_v15, %s1601_s18  ;;  %v334_v32 = vmul.f32 %v330_v25, %v1880_v6  ;;  %v335_v33 = vmul.f32 %v328_v24, %v1885_v7  ;;  %v527_v24 = vrot.slane %v526_v2, 1 }
 0x109   : > { %v368_v26 = vpop.permute.xlu1 %367  ;;  %v366_v27 = vpop.permute.xlu0 %365  ;;  %v336_v46 = vadd.f32 %v334_v32, %v332_v34  ;;  %v343_v47 = vadd.f32 %v335_v33, %v333_v35  ;;  %v2008_v32 = vrot.slane %v379_v20, %v1984_v61 }
 0x10b   : > { %1078 = vrot.lane.b32.xlu1 %v827_v16, %s1601_s18  ;;  %1076 = vrot.lane.b32.xlu0 %v825_v17, %s1601_s18  ;;  %v337_v57 = vrot.slane %v336_v46, 4  ;;  %v344_v58 = vrot.slane %v343_v47, 4 }
 0x10d   : > { %v372_v36 = vpop.permute.xlu1 %371  ;;  %v370_v37 = vpop.permute.xlu0 %369  ;;  %v338_v12 = vadd.f32 %v337_v57, %v336_v46  ;;  %v345_v13 = vadd.f32 %v344_v58, %v343_v47  ;;  %v427_v46 = vld [vmem:[#allocation2 + $0x4] sm:$0x3]  ;;  %v510_v47 = vld [vmem:[#allocation2 + $0x8] sm:$0x3] }
 0x10e   : > { %v375_v40 = vsel %vm373_vm1, %v368_v26, %v372_v36  ;;  %v377_v41 = vsel %vm373_vm1, %v372_v36, %v368_v26  ;;  %v374_v42 = vsel %vm373_vm1, %v366_v27, %v370_v37  ;;  %v376_v43 = vsel %vm373_vm1, %v370_v37, %v366_v27 }
 0x10f   : > { %v382_v44 = vmul.f32 %v377_v41, %v1880_v6  ;;  %v383_v45 = vmul.f32 %v375_v40, %v1885_v7  ;;  %v380_v48 = vmul.f32 %v376_v43, %v1874_v4  ;;  %v381_v49 = vmul.f32 %v374_v42, %v1877_v5 }
 0x110   : > { %v339_v29 = vrot.slane %v338_v12, 2  ;;  %v346_v30 = vrot.slane %v345_v13, 2  ;;  %v2012_v37 = vrot.slane %v379_v20, %v1986_v62  ;;  %v521_v40 = vadd.f32 %v520_v23, %v519_v1 }
 0x111   : > { %v416_v50 = vpop.permute.xlu1 %415  ;;  %v414_v51 = vpop.permute.xlu0 %413  ;;  %v384_v55 = vadd.f32 %v382_v44, %v380_v48  ;;  %v391_v56 = vadd.f32 %v383_v45, %v381_v49  ;;  %v528_v41 = vadd.f32 %v527_v24, %v526_v2  ;;  %v2027_v58 = vrot.slane %v427_v46, %v1984_v61 }
 0x112   : > { %v340_v48 = vadd.f32 %v339_v29, %v338_v12  ;;  %v347_v49 = vadd.f32 %v346_v30, %v345_v13 }
 0x113   : > { %v385_v3 = vrot.slane %v384_v55, 4  ;;  %v392_v8 = vrot.slane %v391_v56, 4  ;;  %v530_v11 = vmul.f32 0.25, %v528_v41 }
 0x115   : > { %v420_v59 = vpop.permute.xlu1 %419  ;;  %v418_v60 = vpop.permute.xlu0 %417  ;;  %v386_v25 = vadd.f32 %v385_v3, %v384_v55  ;;  %v393_v26 = vadd.f32 %v392_v8, %v391_v56  ;;  %v341_v8 = vrot.slane %v340_v48, 1 }
 0x116   : > { %v423_v63 = vsel %vm421_vm2, %v416_v50, %v420_v59  ;;  %v425_v0 = vsel %vm421_vm2, %v420_v59, %v416_v50  ;;  %v422_v14 = vsel %vm421_vm2, %v414_v51, %v418_v60  ;;  %v424_v15 = vsel %vm421_vm2, %v418_v60, %v414_v51 }
 0x117   : > { %v430_v9 = vmul.f32 %v425_v0, %v1880_v6  ;;  %v431_v10 = vmul.f32 %v423_v63, %v1885_v7  ;;  %v428_v16 = vmul.f32 %v424_v15, %v1874_v4  ;;  %v429_v17 = vmul.f32 %v422_v14, %v1877_v5 }
 0x118   : > { %v387_v42 = vrot.slane %v386_v25, 2  ;;  %v394_v43 = vrot.slane %v393_v26, 2  ;;  %v2030_v59 = vrot.slane %v427_v46, %v1986_v62  ;;  %v2033_v60 = vrot.slane %v510_v47, %v1984_v61 }
 0x119   : > { %v464_v18 = vpop.permute.xlu1 %463  ;;  %v462_v19 = vpop.permute.xlu0 %461  ;;  %v432_v27 = vadd.f32 %v430_v9, %v428_v16  ;;  %v439_v28 = vadd.f32 %v431_v10, %v429_v17  ;;  %v2036_v63 = vrot.slane %v510_v47, %v1986_v62  ;;  %v348_v9 = vrot.slane %v347_v49, 1 }
 0x11a   : > { %v388_v0 = vadd.f32 %v387_v42, %v386_v25  ;;  %v395_v1 = vadd.f32 %v394_v43, %v393_v26  ;;  %v529_v10 = vmul.f32 0.25, %v521_v40 }
 0x11b   : > { %v433_v33 = vrot.slane %v432_v27, 4  ;;  %v440_v34 = vrot.slane %v439_v28, 4 }
 0x11c   : > { %v389_v24 = vrot.slane %v388_v0, 1  ;;  %v396_v25 = vrot.slane %v395_v1, 1 }
 0x11d   : > { %v468_v35 = vpop.permute.xlu1 %467  ;;  %v466_v36 = vpop.permute.xlu0 %465  ;;  %v434_v52 = vadd.f32 %v433_v33, %v432_v27  ;;  %v441_v53 = vadd.f32 %v440_v34, %v439_v28  ;;  %v475_v34 = vld [vmem:[#allocation2 + $0x6] sm:$0x3] }
 0x11e   : > { %v471_v38 = vsel %vm469_vm3, %v464_v18, %v468_v35  ;;  %v473_v39 = vsel %vm469_vm3, %v468_v35, %v464_v18  ;;  %v470_v50 = vsel %vm469_vm3, %v462_v19, %v466_v36  ;;  %v472_v51 = vsel %vm469_vm3, %v466_v36, %v462_v19 }
 0x11f   : > { %v478_v44 = vmul.f32 %v473_v39, %v1880_v6  ;;  %v479_v45 = vmul.f32 %v471_v38, %v1885_v7  ;;  %v476_v54 = vmul.f32 %v472_v51, %v1874_v4  ;;  %v477_v55 = vmul.f32 %v470_v50, %v1877_v5 }
 0x120   : > { %v435_v12 = vrot.slane %v434_v52, 2  ;;  %v442_v13 = vrot.slane %v441_v53, 2  ;;  %v342_v35 = vadd.f32 %v341_v8, %v340_v48  ;;  %v349_v36 = vadd.f32 %v348_v9, %v347_v49 }
 0x121   : > { %v547_v56 = vpop.permute.xlu1 %546  ;;  %v545_v57 = vpop.permute.xlu0 %544  ;;  %v480_v2 = vadd.f32 %v478_v44, %v476_v54  ;;  %v487_v3 = vadd.f32 %v479_v45, %v477_v55  ;;  %v390_v46 = vadd.f32 %v389_v24, %v388_v0  ;;  %v397_v47 = vadd.f32 %v396_v25, %v395_v1 }
 0x122   : > { %v436_v38 = vadd.f32 %v435_v12, %v434_v52  ;;  %v443_v39 = vadd.f32 %v442_v13, %v441_v53  ;;  %v2052_v50 = vrot.slane %v475_v34, %v1984_v61  ;;  %v2055_v51 = vrot.slane %v475_v34, %v1986_v62 }
 0x123   : > { %v481_v14 = vrot.slane %v480_v2, 4  ;;  %v488_v15 = vrot.slane %v487_v3, 4  ;;  %v2058_v48 = vmul.f32 %v2033_v60, %v529_v10  ;;  %v2061_v49 = vmul.f32 %v2036_v63, %v530_v11 }
 0x124   : > { %v350_v52 = vmul.f32 0.25, %v342_v35  ;;  %v351_v53 = vmul.f32 0.25, %v349_v36  ;;  %v398_v12 = vmul.f32 0.25, %v390_v46  ;;  %v399_v10 = vmul.f32 0.25, %v397_v47 }
 0x125   : > { %v551_v16 = vpop.permute.xlu1 %550  ;;  %v549_v17 = vpop.permute.xlu0 %548  ;;  %v482_v26 = vadd.f32 %v481_v14, %v480_v2  ;;  %v489_v27 = vadd.f32 %v488_v15, %v487_v3  ;;  %v558_v14 = vld [vmem:[#allocation2 + $0xa] sm:$0x3] }
 0x126   : > { %v554_v18 = vsel %vm552_vm4, %v547_v56, %v551_v16  ;;  %v556_v19 = vsel %vm552_vm4, %v551_v16, %v547_v56  ;;  %v553_v20 = vsel %vm552_vm4, %v545_v57, %v549_v17  ;;  %v555_v23 = vsel %vm552_vm4, %v549_v17, %v545_v57 }
 0x127   : > { %v561_v28 = vmul.f32 %v554_v18, %v1880_v6  ;;  %v562_v29 = vmul.f32 %v556_v19, %v1885_v7  ;;  %v559_v30 = vmul.f32 %v553_v20, %v1874_v4  ;;  %v560_v33 = vmul.f32 %v555_v23, %v1877_v5 }
 0x128   : > { %v483_v42 = vrot.slane %v482_v26, 2  ;;  %v490_v43 = vrot.slane %v489_v27, 2  ;;  %v437_v56 = vrot.slane %v436_v38, 1  ;;  %v444_v57 = vrot.slane %v443_v39, 1 }
 0x129   : > { %v595_v40 = vpop.permute.xlu1 %594  ;;  %v593_v41 = vpop.permute.xlu0 %592  ;;  %v563_v44 = vadd.f32 %v561_v28, %v559_v30  ;;  %v570_v45 = vadd.f32 %v562_v29, %v560_v33  ;;  %v2077_v29 = vrot.slane %v558_v14, %v1984_v61  ;;  %v2080_v34 = vmul.f32 %v2002_v22, %v350_v52 }
 0x12a   : > { %v484_v2 = vadd.f32 %v483_v42, %v482_v26  ;;  %v491_v3 = vadd.f32 %v490_v43, %v489_v27  ;;  %v438_v19 = vadd.f32 %v437_v56, %v436_v38  ;;  %v445_v20 = vadd.f32 %v444_v57, %v443_v39 }
 0x12b   : > { %v564_v54 = vrot.slane %v563_v44, 4  ;;  %v571_v55 = vrot.slane %v570_v45, 4  ;;  %v2083_v35 = vmul.f32 %v2005_v31, %v351_v53  ;;  %v2086_v39 = vmul.f32 %v2008_v32, %v398_v12 }
 0x12c   : > { %v485_v27 = vrot.slane %v484_v2, 1  ;;  %v492_v28 = vrot.slane %v491_v3, 1  ;;  %v447_v42 = vmul.f32 0.25, %v445_v20 }
 0x12d   : > { %v599_v0 = vpop.permute.xlu1 %598  ;;  %v597_v1 = vpop.permute.xlu0 %596  ;;  %v565_v15 = vadd.f32 %v564_v54, %v563_v44  ;;  %v572_v16 = vadd.f32 %v571_v55, %v570_v45 }
 0x12e   : > { %v602_v8 = vsel %vm600_vm5, %v595_v40, %v599_v0  ;;  %v604_v9 = vsel %vm600_vm5, %v599_v0, %v595_v40  ;;  %v601_v17 = vsel %vm600_vm5, %v593_v41, %v597_v1  ;;  %v603_v18 = vsel %vm600_vm5, %v597_v1, %v593_v41 }
 0x12f   : > { %v609_v13 = vmul.f32 %v602_v8, %v1880_v6  ;;  %v610_v11 = vmul.f32 %v604_v9, %v1885_v7  ;;  %v607_v23 = vmul.f32 %v601_v17, %v1874_v4  ;;  %v608_v24 = vmul.f32 %v603_v18, %v1877_v5 }
 0x130   : > { %v566_v36 = vrot.slane %v565_v15, 2  ;;  %v573_v38 = vrot.slane %v572_v16, 2  ;;  %v2089_v40 = vmul.f32 %v2012_v37, %v399_v10  ;;  %v446_v41 = vmul.f32 0.25, %v438_v19 }
 0x131   : > { %v643_v25 = vpop.permute.xlu1 %642  ;;  %v641_v26 = vpop.permute.xlu0 %640  ;;  %v611_v30 = vadd.f32 %v609_v13, %v607_v23  ;;  %v618_v33 = vadd.f32 %v610_v11, %v608_v24  ;;  %v486_v47 = vadd.f32 %v485_v27, %v484_v2  ;;  %v493_v54 = vadd.f32 %v492_v28, %v491_v3 }
 0x132   : > { %v567_v1 = vadd.f32 %v566_v36, %v565_v15  ;;  %v574_v8 = vadd.f32 %v573_v38, %v572_v16  ;;  %v2105_v18 = vrot.slane %v558_v14, %v1986_v62  ;;  %v736_v15 = vmax.f32 %v2080_v34, %v2086_v39 }
 0x133   : > { %v612_v43 = vrot.slane %v611_v30, 4  ;;  %v619_v44 = vrot.slane %v618_v33, 4  ;;  %v737_v16 = vmax.f32 %v2083_v35, %v2089_v40  ;;  %v2112_v27 = vmul.f32 %v2027_v58, %v446_v41 }
 0x134   : > { %v2115_v28 = vmul.f32 %v2030_v59, %v447_v42  ;;  %v568_v14 = vrot.slane %v567_v1, 1 }
 0x135   : > { %v647_v45 = vpop.permute.xlu1 %646  ;;  %v645_v46 = vpop.permute.xlu0 %644  ;;  %v613_v53 = vadd.f32 %v612_v43, %v611_v30  ;;  %v620_v56 = vadd.f32 %v619_v44, %v618_v33  ;;  %v575_v30 = vrot.slane %v574_v8, 1 }
 0x136   : > { %v650_v55 = vsel %vm648_vm6, %v643_v25, %v647_v45  ;;  %v652_v52 = vsel %vm648_vm6, %v647_v45, %v643_v25  ;;  %v649_v9 = vsel %vm648_vm6, %v641_v26, %v645_v46  ;;  %v651_v2 = vsel %vm648_vm6, %v645_v46, %v641_v26 }
 0x137   : > { %v657_v57 = vmul.f32 %v650_v55, %v1880_v6  ;;  %v658_v0 = vmul.f32 %v652_v52, %v1885_v7  ;;  %v614_v3 = vrot.slane %v613_v53, 2  ;;  %v621_v12 = vrot.slane %v620_v56, 2 }
 0x138   : > { %v655_v10 = vmul.f32 %v649_v9, %v1874_v4  ;;  %v656_v13 = vmul.f32 %v651_v2, %v1877_v5  ;;  %v494_v25 = vmul.f32 0.25, %v486_v47  ;;  %v495_v26 = vmul.f32 0.25, %v493_v54 }
 0x139   : > { %v691_v11 = vpop.permute.xlu1 %690  ;;  %v689_v17 = vpop.permute.xlu0 %688  ;;  %v615_v19 = vadd.f32 %v614_v3, %v613_v53  ;;  %v622_v20 = vadd.f32 %v621_v12, %v620_v56  ;;  %v576_v9 = vadd.f32 %v575_v30, %v574_v8 }
 0x13a   : > { %v659_v23 = vadd.f32 %v657_v57, %v655_v10  ;;  %v666_v24 = vadd.f32 %v658_v0, %v656_v13  ;;  %v569_v0 = vadd.f32 %v568_v14, %v567_v1  ;;  %v738_v13 = vmax.f32 %v736_v15, %v2112_v27 }
 0x13b   : > { %v616_v42 = vrot.slane %v615_v19, 1  ;;  %v623_v47 = vrot.slane %v622_v20, 1 }
 0x13c   : > { %v660_v33 = vrot.slane %v659_v23, 4  ;;  %v667_v36 = vrot.slane %v666_v24, 4  ;;  %v577_v30 = vmul.f32 0.25, %v569_v0 }
 0x13d   : > { %v695_v38 = vpop.permute.xlu1 %694  ;;  %v693_v43 = vpop.permute.xlu0 %692 }
 0x13e   : > { %v698_v44 = vsel %vm696_vm7, %v691_v11, %v695_v38  ;;  %v700_v45 = vsel %vm696_vm7, %v695_v38, %v691_v11  ;;  %v697_v46 = vsel %vm696_vm7, %v689_v17, %v693_v43  ;;  %v699_v41 = vsel %vm696_vm7, %v693_v43, %v689_v17 }
 0x13f   : > { %v661_v54 = vadd.f32 %v660_v33, %v659_v23  ;;  %v668_v55 = vadd.f32 %v667_v36, %v666_v24  ;;  %v705_v52 = vmul.f32 %v698_v44, %v1880_v6  ;;  %v706_v53 = vmul.f32 %v700_v45, %v1885_v7  ;;  %v606_v24 = vld [vmem:[#allocation2 + $0xc] sm:$0x3] }
 0x140   : > { %v703_v56 = vmul.f32 %v697_v46, %v1874_v4  ;;  %v704_v57 = vmul.f32 %v699_v41, %v1877_v5  ;;  %v739_v11 = vmax.f32 %v737_v16, %v2115_v28  ;;  %v2132_v6 = vmul.f32 %v2052_v50, %v494_v25 }
 0x141   : > { %v662_v2 = vrot.slane %v661_v54, 2  ;;  %v669_v3 = vrot.slane %v668_v55, 2  ;;  %v2135_v4 = vmul.f32 %v2055_v51, %v495_v26  ;;  %v617_v5 = vadd.f32 %v616_v42, %v615_v19  ;;  %v2137_v14 = vpop.permute.xlu1 %830  ;;  %v654_v26 = vld [vmem:[#allocation2 + $0xe] sm:$0x3] }
 0x142   : > { %v707_v12 = vadd.f32 %v705_v52, %v703_v56  ;;  %v714_v10 = vadd.f32 %v706_v53, %v704_v57  ;;  %v624_v7 = vadd.f32 %v623_v47, %v622_v20  ;;  %v578_v33 = vmul.f32 0.25, %v576_v9 }
 0x143   : > { %v663_v17 = vadd.f32 %v662_v2, %v661_v54  ;;  %v670_v23 = vadd.f32 %v669_v3, %v668_v55  ;;  %v2140_v43 = vrot.slane %v606_v24, %v1984_v61  ;;  %v2143_v25 = vrot.slane %v606_v24, %v1986_v62  ;;  %v2147_v54 = vpop.permute.xlu0 %828  ;;  %v702_v3 = vld [vmem:[#allocation2 + $0x10] sm:$0x3] }
 0x144   : > { %v708_v1 = vrot.slane %v707_v12, 4  ;;  %v715_v8 = vrot.slane %v714_v10, 4  ;;  %v740_v20 = vmax.f32 %v738_v13, %v2132_v6  ;;  %v741_v45 = vmax.f32 %v739_v11, %v2135_v4 }
 0x145   : > { %v664_v15 = vrot.slane %v663_v17, 1  ;;  %v671_v36 = vrot.slane %v670_v23, 1  ;;  %v625_v46 = vmul.f32 0.25, %v617_v5  ;;  %v626_v41 = vmul.f32 0.25, %v624_v7 }
 0x146   : > { %v709_v16 = vadd.f32 %v708_v1, %v707_v12  ;;  %v716_v38 = vadd.f32 %v715_v8, %v714_v10  ;;  %v2150_v55 = vrot.slane %v654_v26, %v1984_v61  ;;  %v2153_v52 = vrot.slane %v654_v26, %v1986_v62  ;;  %v2161_v12 = vpop.permute.xlu1 %834 }
 0x147   : > { %v665_v44 = vadd.f32 %v664_v15, %v663_v17  ;;  %v672_v19 = vadd.f32 %v671_v36, %v670_v23  ;;  %v2156_v53 = vmul.f32 %v2077_v29, %v577_v30  ;;  %v2159_v56 = vmul.f32 %v2105_v18, %v578_v33 }
 0x148   : > { %v710_v42 = vrot.slane %v709_v16, 2  ;;  %v717_v47 = vrot.slane %v716_v38, 2  ;;  %v742_v10 = vmax.f32 %v740_v20, %v2058_v48  ;;  %v743_v13 = vmax.f32 %v741_v45, %v2061_v49 }
 0x149   : > { %v673_v57 = vmul.f32 0.25, %v665_v44  ;;  %v674_v0 = vmul.f32 0.25, %v672_v19  ;;  %v2166_v23 = vmul.f32 %v2140_v43, %v625_v46  ;;  %v2169_v24 = vmul.f32 %v2143_v25, %v626_v41 }
 0x14a   : > { %v711_v9 = vadd.f32 %v710_v42, %v709_v16  ;;  %v718_v2 = vadd.f32 %v717_v47, %v716_v38  ;;  %v2172_v5 = vrot.slane %v702_v3, %v1984_v61  ;;  %v2175_v7 = vrot.slane %v702_v3, %v1986_v62  ;;  %v2185_v16 = vpop.permute.xlu0 %832  ;;  %v2189_v19 = vpop.permute.xlu1 %862 }
 0x14b   : > { %v744_v1 = vmax.f32 %v742_v10, %v2156_v53  ;;  %v745_v8 = vmax.f32 %v743_v13, %v2159_v56  ;;  %v2180_v15 = vmul.f32 %v2150_v55, %v673_v57  ;;  %v2183_v36 = vmul.f32 %v2153_v52, %v674_v0 }
 0x14c   : > { %v712_v11 = vrot.slane %v711_v9, 1  ;;  %v719_v17 = vrot.slane %v718_v2, 1  ;;  %2578 = vst [vmem:[#allocation18_spill] sm:$0xff] %v2172_v5  ;;  %2579 = vst [vmem:[#allocation19_spill] sm:$0xff] %v2175_v7 }
 0x14d   : > { %v746_v44 = vmax.f32 %v744_v1, %v2166_v23  ;;  %v747_v62 = vmax.f32 %v745_v8, %v2169_v24 }
 0x14e   : > { %v713_v30 = vadd.f32 %v712_v11, %v711_v9  ;;  %v720_v33 = vadd.f32 %v719_v17, %v718_v2  ;;  %v2195_v57 = vpop.permute.xlu0 %860  ;;  %v2201_v10 = vpop.permute.xlu1 %866 }
 0x14f   : > { %v748_v46 = vmax.f32 %v746_v44, %v2180_v15  ;;  %v749_v41 = vmax.f32 %v747_v62, %v2183_v36 }
 0x150   : > { %v721_v38 = vmul.f32 0.25, %v713_v30  ;;  %v722_v26 = vmul.f32 0.25, %v720_v33 }
 0x152   : > { %v734_v20 = vmul.f32 %v2172_v5, %v721_v38  ;;  %v735_v45 = vmul.f32 %v2175_v7, %v722_v26  ;;  %v2208_v38 = vpop.permute.xlu0 %864  ;;  %v2212_v44 = vpop.permute.xlu1 %894 }
 0x154   : > { %v750_v42 = vmax.f32 %v748_v46, %v734_v20  ;;  %v751_v47 = vmax.f32 %v749_v41, %v735_v45 }
 0x156   : > { %v752_v0 = vsub.f32 %v2080_v34, %v750_v42  ;;  %v753_v9 = vsub.f32 %v2083_v35, %v751_v47  ;;  %v758_v2 = vsub.f32 %v2086_v39, %v750_v42  ;;  %v759_v3 = vsub.f32 %v2089_v40, %v751_v47 }
 0x157   : > { %v764_v13 = vsub.f32 %v2112_v27, %v750_v42  ;;  %v765_v11 = vsub.f32 %v2115_v28, %v751_v47  ;;  %v770_v30 = vsub.f32 %v2132_v6, %v750_v42  ;;  %v771_v34 = vsub.f32 %v2135_v4, %v751_v47 }
 0x158   : > { %v754_v17 = vmul.f32 1.442695, %v752_v0  ;;  %v756_v1 = vmul.f32 1.442695, %v753_v9  ;;  %v760_v8 = vmul.f32 1.442695, %v758_v2  ;;  %v776_v39 = vsub.f32 %v2058_v48, %v750_v42  ;;  %v2218_v9 = vpop.permute.xlu0 %892 }
 0x159   : > { %v762_v33 = vmul.f32 1.442695, %v759_v3  ;;  %v766_v35 = vmul.f32 1.442695, %v764_v13  ;;  %v768_v40 = vmul.f32 1.442695, %v765_v11  ;;  %v777_v27 = vsub.f32 %v2061_v49, %v751_v47  ;;  %v2221_v13 = vpop.permute.xlu1 %898 }
 0x15a   : > { %1358 = vpow2.f32 %v754_v17  ;;  %v772_v28 = vmul.f32 1.442695, %v770_v30  ;;  %v782_v26 = vsub.f32 %v2156_v53, %v750_v42  ;;  %v774_v6 = vmul.f32 1.442695, %v771_v34 }
 0x15b   : > { %1360 = vpow2.f32 %v756_v1  ;;  %v783_v4 = vsub.f32 %v2159_v56, %v751_v47  ;;  %v778_v62 = vmul.f32 1.442695, %v776_v39  ;;  %v788_v48 = vsub.f32 %v2166_v23, %v750_v42 }
 0x15c   : > { %1362 = vpow2.f32 %v760_v8  ;;  %v780_v46 = vmul.f32 1.442695, %v777_v27  ;;  %v789_v41 = vsub.f32 %v2169_v24, %v751_v47  ;;  %v784_v49 = vmul.f32 1.442695, %v782_v26  ;;  %v2223_v1 = vpop.permute.xlu0 %896 }
 0x15d   : > { %1364 = vpow2.f32 %v762_v33  ;;  %v794_v0 = vsub.f32 %v2180_v15, %v750_v42  ;;  %v786_v53 = vmul.f32 1.442695, %v783_v4  ;;  %v795_v2 = vsub.f32 %v2183_v36, %v751_v47 }
 0x15e   : > { %1366 = vpow2.f32 %v766_v35  ;;  %v790_v56 = vmul.f32 1.442695, %v788_v48  ;;  %v800_v3 = vsub.f32 %v734_v20, %v750_v42  ;;  %v792_v23 = vmul.f32 1.442695, %v789_v41  ;;  %v927_v20 = vpop.permute.xlu1 %926 }
 0x15f   : > { %1368 = vpow2.f32 %v768_v40  ;;  %v801_v11 = vsub.f32 %v735_v45, %v751_v47  ;;  %v796_v24 = vmul.f32 1.442695, %v794_v0  ;;  %v798_v17 = vmul.f32 1.442695, %v795_v2 }
 0x160   : > { %1370 = vpow2.f32 %v772_v28  ;;  %v802_v15 = vmul.f32 1.442695, %v800_v3  ;;  %v925_v40 = vpop.permute.xlu0 %924 }
 0x161   : > { %1372 = vpow2.f32 %v774_v6  ;;  %v804_v36 = vmul.f32 1.442695, %v801_v11 }
 0x162   : > { %1374 = vpow2.f32 %v778_v62  ;;  %v931_v4 = vpop.permute.xlu1 %930 }
 0x163   : > { %1376 = vpow2.f32 %v780_v46  ;;  %v935_v5 = vsel %vm469_vm3, %v931_v4, %v927_v20 }
 0x164   : > { %1378 = vpow2.f32 %v784_v49 }
 0x165   : > { %1380 = vpow2.f32 %v786_v53 }
 0x166   : > { %1382 = vpow2.f32 %v790_v56  ;;  %v929_v56 = vpop.permute.xlu0 %928 }
 0x167   : > { %v2225_v8 = vpop.eup %1358  ;;  %1384 = vpow2.f32 %v792_v23 }
 0x168   : > { %v2227_v30 = vpop.eup %1360  ;;  %1386 = vpow2.f32 %v796_v24 }
 0x169   : > { %v2229_v42 = vpop.eup %1362  ;;  %1388 = vpow2.f32 %v798_v17  ;;  %v979_v17 = vpop.permute.xlu1 %978 }
 0x16a   : > { %v2231_v45 = vpop.eup %1364  ;;  %1390 = vpow2.f32 %v802_v15  ;;  %v806_v47 = vadd.f32 %v2229_v42, %v2225_v8 }
 0x16b   : > { %v2235_v33 = vpop.eup %1366  ;;  %1392 = vpow2.f32 %v804_v36  ;;  %v807_v34 = vadd.f32 %v2231_v45, %v2227_v30 }
 0x16c   : > { %v2239_v35 = vpop.eup %1368  ;;  %v808_v39 = vadd.f32 %v2235_v33, %v806_v47 }
 0x16d   : > { %v2242_v27 = vpop.eup %1370  ;;  %v809_v28 = vadd.f32 %v2239_v35, %v807_v34 }
 0x16e   : > { %v2245_v26 = vpop.eup %1372  ;;  %v810_v6 = vadd.f32 %v2242_v27, %v808_v39 }
 0x16f   : > { %v2248_v62 = vpop.eup %1374  ;;  %v811_v48 = vadd.f32 %v2245_v26, %v809_v28 }
 0x170   : > { %v2251_v46 = vpop.eup %1376  ;;  %v812_v41 = vadd.f32 %v2248_v62, %v810_v6 }
 0x171   : > { %v2254_v49 = vpop.eup %1378  ;;  %v813_v0 = vadd.f32 %v2251_v46, %v811_v48 }
 0x172   : > { %v2257_v53 = vpop.eup %1380  ;;  %v814_v2 = vadd.f32 %v2254_v49, %v812_v41  ;;  %v977_v41 = vpop.permute.xlu0 %976 }
 0x173   : > { %v2260_v3 = vpop.eup %1382  ;;  %v815_v23 = vadd.f32 %v2257_v53, %v813_v0 }
 0x174   : > { %v2263_v11 = vpop.eup %1384  ;;  %v816_v24 = vadd.f32 %v2260_v3, %v814_v2  ;;  %v983_v2 = vpop.permute.xlu1 %982 }
 0x175   : > { %v2266_v15 = vpop.eup %1386  ;;  %v817_v36 = vadd.f32 %v2263_v11, %v815_v23 }
 0x176   : > { %v2269_v47 = vpop.eup %1388  ;;  %v818_v34 = vadd.f32 %v2266_v15, %v816_v24  ;;  %v981_v7 = vpop.permute.xlu0 %980  ;;  %v837_v24 = vsel %vm326_vm0, %v2137_v14, %v2161_v12 }
 0x177   : > { %v2272_v39 = vpop.eup %1390  ;;  %v819_v28 = vadd.f32 %v2269_v47, %v817_v36  ;;  %v839_v36 = vsel %vm326_vm0, %v2161_v12, %v2137_v14  ;;  %v871_v14 = vsel %vm373_vm1, %v2201_v10, %v2189_v19  ;;  %v868_v12 = vsel %vm373_vm1, %v2195_v57, %v2208_v38 }
 0x178   : > { %2580 = vst [vmem:[#allocation20_spill] sm:$0xff] %v2272_v39  ;;  %v2275_v6 = vpop.eup %1392  ;;  %v820_v48 = vadd.f32 %v2272_v39, %v818_v34  ;;  %v1011_v23 = vpop.permute.xlu1 %1010  ;;  %v836_v34 = vsel %vm326_vm0, %v2147_v54, %v2185_v16  ;;  %v2343_v39 = vsel %vm552_vm4, %v983_v2, %v979_v17 }
 0x179   : > { %2581 = vst [vmem:[#allocation21_spill] sm:$0xff] %v2275_v6  ;;  %v821_v0 = vadd.f32 %v2275_v6, %v819_v28  ;;  %v838_v28 = vsel %vm326_vm0, %v2185_v16, %v2147_v54  ;;  %v870_v54 = vsel %vm373_vm1, %v2208_v38, %v2195_v57  ;;  %v901_v16 = vsel %vm421_vm2, %v2212_v44, %v2221_v13 }
 0x17a   : > { %1394 = vrcp.f32 %v820_v48  ;;  %v869_v48 = vsel %vm373_vm1, %v2189_v19, %v2201_v10  ;;  %v903_v19 = vsel %vm421_vm2, %v2221_v13, %v2212_v44  ;;  %v2319_v10 = vpop.permute.xlu0 %1008  ;;  %v902_v57 = vsel %vm421_vm2, %v2223_v1, %v2218_v9  ;;  %2583 = vst [vmem:[#allocation23_spill] sm:$0xff] %v2343_v39 }
 0x17b   : > { %1396 = vrcp.f32 %v821_v0  ;;  %v900_v0 = vsel %vm421_vm2, %v2218_v9, %v2223_v1  ;;  %v933_v38 = vsel %vm469_vm3, %v927_v20, %v931_v4  ;;  %v932_v44 = vsel %vm469_vm3, %v925_v40, %v929_v56 }
 0x17c   : > { %v934_v13 = vsel %vm469_vm3, %v929_v56, %v925_v40  ;;  %v2339_v6 = vsel %vm552_vm4, %v979_v17, %v983_v2  ;;  %v1015_v9 = vpop.permute.xlu1 %1014  ;;  %v2349_v20 = vsel %vm552_vm4, %v977_v41, %v981_v7  ;;  %v2353_v4 = vsel %vm552_vm4, %v981_v7, %v977_v41 }
 0x17d   : > { %2582 = vst [vmem:[#allocation22_spill] sm:$0xff] %v2339_v6  ;;  %2584 = vst [vmem:[#allocation24_spill] sm:$0xff] %v2349_v20  ;;  %v2357_v40 = vsel %vm600_vm5, %v1011_v23, %v1015_v9  ;;  %v2361_v56 = vsel %vm600_vm5, %v1015_v9, %v1011_v23 }
 0x17e   : > { %2585 = vst [vmem:[#allocation25_spill] sm:$0xff] %v2353_v4  ;;  %2586 = vst [vmem:[#allocation26_spill] sm:$0xff] %v2357_v40  ;;  %v2385_v4 = vpop.permute.xlu0 %1012 }
 0x17f   : > { %2587 = vst [vmem:[#allocation27_spill] sm:$0xff] %v2361_v56 }
 0x187   : > { %v2345_v1 = vpop.eup %1394 }
 0x188   : > { %v2363_v17 = vpop.eup %1396  ;;  %v840_v2 = vmul.f32 %v2345_v1, %v2225_v8  ;;  %v872_v20 = vmul.f32 %v2345_v1, %v2229_v42  ;;  %v904_v7 = vmul.f32 %v2345_v1, %v2235_v33  ;;  %v936_v41 = vmul.f32 %v2345_v1, %v2242_v27 }
 0x189   : > { %v841_v40 = vmul.f32 %v2363_v17, %v2227_v30  ;;  %v873_v23 = vmul.f32 %v2363_v17, %v2231_v45  ;;  %v905_v9 = vmul.f32 %v2363_v17, %v2239_v35  ;;  %v937_v8 = vmul.f32 %v2363_v17, %v2245_v26 }
 0x18a   : > { %v842_v42 = vmul.f32 %v840_v2, %v2002_v22  ;;  %v874_v56 = vmul.f32 %v872_v20, %v2008_v32  ;;  %v906_v33 = vmul.f32 %v904_v7, %v2027_v58  ;;  %v938_v27 = vmul.f32 %v936_v41, %v2052_v50  ;;  %v2399_v7 = vpop.permute.xlu1 %1042 }
 0x18b   : > { %v843_v30 = vmul.f32 %v841_v40, %v2005_v31  ;;  %v875_v45 = vmul.f32 %v873_v23, %v2012_v37  ;;  %v907_v39 = vmul.f32 %v905_v9, %v2030_v59  ;;  %v939_v35 = vmul.f32 %v937_v8, %v2055_v51 }
 0x18c   : > { %v847_v26 = vrot.slane %v842_v42, %v1984_v61  ;;  %v879_v22 = vrot.slane %v874_v56, %v1984_v61  ;;  %v911_v32 = vrot.slane %v906_v33, %v1984_v61  ;;  %v943_v58 = vrot.slane %v938_v27, %v1984_v61 }
 0x18d   : > { %v851_v50 = vrot.slane %v843_v30, %v1984_v61  ;;  %v883_v20 = vrot.slane %v875_v45, %v1984_v61  ;;  %v915_v31 = vrot.slane %v907_v39, %v1984_v61  ;;  %v947_v37 = vrot.slane %v939_v35, %v1984_v61  ;;  %v2401_v30 = vpop.permute.xlu0 %1040 }
 0x18e   : > { %v854_v40 = vmul.f32 %v847_v26, %v839_v36  ;;  %v852_v59 = vmul.f32 %v847_v26, %v838_v28  ;;  %v886_v2 = vmul.f32 %v879_v22, %v871_v14  ;;  %v884_v51 = vmul.f32 %v879_v22, %v870_v54 }
 0x18f   : > { %v855_v41 = vmul.f32 %v851_v50, %v837_v24  ;;  %v853_v56 = vmul.f32 %v851_v50, %v836_v34  ;;  %v887_v23 = vmul.f32 %v883_v20, %v869_v48  ;;  %v885_v9 = vmul.f32 %v883_v20, %v868_v12 }
 0x190   : > { %v890_v8 = vadd.f32 %v886_v2, %v854_v40  ;;  %v888_v42 = vadd.f32 %v884_v51, %v852_v59  ;;  %v918_v33 = vmul.f32 %v911_v32, %v903_v19  ;;  %v919_v27 = vmul.f32 %v915_v31, %v901_v16  ;;  %v1399_v40 = vld [vmem:[%s1857_s13 + $0x18] sm:$0xff]  ;;  %v1400_v59 = vld [vmem:[%s1857_s13] sm:$0xff] }
 0x191   : > { %v891_v45 = vadd.f32 %v887_v23, %v855_v41  ;;  %v889_v39 = vadd.f32 %v885_v9, %v853_v56  ;;  %v916_v6 = vmul.f32 %v911_v32, %v902_v57  ;;  %v917_v35 = vmul.f32 %v915_v31, %v900_v0  ;;  %v1047_v0 = vpop.permute.xlu1 %1046  ;;  %v2588_v56 = vld [vmem:[#allocation22_spill] sm:$0xff]  ;;  %v2589_v9 = vld [vmem:[#allocation23_spill] sm:$0xff] }
 0x192   : > { %v922_v36 = vadd.f32 %v918_v33, %v890_v8  ;;  %v950_v28 = vmul.f32 %v943_v58, %v935_v5  ;;  %v951_v14 = vmul.f32 %v947_v37, %v933_v38  ;;  %v1016_v24 = vsel %vm600_vm5, %v2319_v10, %v2385_v4  ;;  %v1401_v8 = vld [vmem:[%s1857_s13 + $0x8] sm:$0xff]  ;;  %v2590_v33 = vld [vmem:[#allocation24_spill] sm:$0xff] }
 0x193   : > { %v923_v34 = vadd.f32 %v919_v27, %v891_v45  ;;  %v920_v48 = vadd.f32 %v916_v6, %v888_v42  ;;  %v921_v12 = vadd.f32 %v917_v35, %v889_v39  ;;  %v948_v54 = vmul.f32 %v943_v58, %v934_v13  ;;  %v1045_v13 = vpop.permute.xlu0 %1044 }
 0x194   : > { %v949_v19 = vmul.f32 %v947_v37, %v932_v44  ;;  %v956_v16 = vmul.f32 %v2345_v1, %v2248_v62  ;;  %v957_v57 = vmul.f32 %v2363_v17, %v2251_v46  ;;  %v988_v5 = vmul.f32 %v2345_v1, %v2254_v49 }
 0x195   : > { %v954_v38 = vadd.f32 %v950_v28, %v922_v36  ;;  %v955_v26 = vadd.f32 %v951_v14, %v923_v34  ;;  %v952_v22 = vadd.f32 %v948_v54, %v920_v48  ;;  %v989_v32 = vmul.f32 %v2363_v17, %v2257_v53  ;;  %v1075_v41 = vpop.permute.xlu1 %1074  ;;  %v2591_v28 = vld [vmem:[#allocation25_spill] sm:$0xff] }
 0x196   : > { %v958_v6 = vmul.f32 %v956_v16, %v2033_v60  ;;  %v959_v44 = vmul.f32 %v957_v57, %v2036_v63  ;;  %v990_v62 = vmul.f32 %v988_v5, %v2077_v29  ;;  %v1020_v46 = vmul.f32 %v2345_v1, %v2260_v3  ;;  %v2592_v57 = vld [vmem:[#allocation26_spill] sm:$0xff] }
 0x197   : > { %v991_v49 = vmul.f32 %v989_v32, %v2105_v18  ;;  %v1021_v58 = vmul.f32 %v2363_v17, %v2263_v11  ;;  %v1052_v53 = vmul.f32 %v2345_v1, %v2266_v15  ;;  %v1053_v60 = vmul.f32 %v2363_v17, %v2269_v47  ;;  %v1398_v15 = vld [vmem:[%s1857_s13 + $0x10] sm:$0xff]  ;;  %v1073_v35 = vpop.permute.xlu0 %1072 }
 0x198   : > { %v963_v63 = vrot.slane %v958_v6, %v1984_v61  ;;  %v967_v29 = vrot.slane %v959_v44, %v1984_v61  ;;  %v995_v3 = vrot.slane %v990_v62, %v1984_v61  ;;  %v1022_v50 = vmul.f32 %v1020_v46, %v2140_v43 }
 0x199   : > { %v953_v18 = vadd.f32 %v949_v19, %v921_v12  ;;  %v999_v20 = vrot.slane %v991_v49, %v1984_v61  ;;  %v1023_v11 = vmul.f32 %v1021_v58, %v2143_v25  ;;  %v1054_v31 = vmul.f32 %v1052_v53, %v2150_v55 }
 0x19a   : > { %v970_v37 = vmul.f32 %v1398_v15, %v963_v63  ;;  %v971_v47 = vmul.f32 %v1399_v40, %v967_v29  ;;  %v968_v2 = vmul.f32 %v1400_v59, %v963_v63  ;;  %v1055_v51 = vmul.f32 %v1053_v60, %v2153_v52  ;;  %v2594_v60 = vld [vmem:[#allocation20_spill] sm:$0xff]  ;;  %v2597_v15 = vld [vmem:[#allocation19_spill] sm:$0xff] }
 0x19b   : > { %v1002_v23 = vmul.f32 %v995_v3, %v2588_v56  ;;  %v1003_v43 = vmul.f32 %v999_v20, %v2589_v9  ;;  %v969_v42 = vmul.f32 %v1401_v8, %v967_v29  ;;  %v1000_v27 = vmul.f32 %v995_v3, %v2590_v33  ;;  %v2595_v29 = vld [vmem:[#allocation21_spill] sm:$0xff] }
 0x19c   : > { %v974_v25 = vadd.f32 %v970_v37, %v954_v38  ;;  %v975_v45 = vadd.f32 %v971_v47, %v955_v26  ;;  %v972_v55 = vadd.f32 %v968_v2, %v952_v22  ;;  %v1027_v39 = vrot.slane %v1022_v50, %v1984_v61  ;;  %v2593_v38 = vld [vmem:[#allocation27_spill] sm:$0xff] }
 0x19d   : > { %v973_v36 = vadd.f32 %v969_v42, %v953_v18  ;;  %v1001_v14 = vmul.f32 %v999_v20, %v2591_v28  ;;  %v1031_v52 = vrot.slane %v1023_v11, %v1984_v61  ;;  %v1018_v34 = vsel %vm600_vm5, %v2385_v4, %v2319_v10  ;;  %v1079_v4 = vpop.permute.xlu1 %1078  ;;  %v2596_v11 = vld [vmem:[#allocation18_spill] sm:$0xff] }
 0x19e   : > { %v1006_v48 = vadd.f32 %v1002_v23, %v974_v25  ;;  %v1007_v12 = vadd.f32 %v1003_v43, %v975_v45  ;;  %v1004_v54 = vadd.f32 %v1000_v27, %v972_v55  ;;  %v1059_v19 = vrot.slane %v1054_v31, %v1984_v61 }
 0x19f   : > { %v1005_v16 = vadd.f32 %v1001_v14, %v973_v36  ;;  %v1034_v5 = vmul.f32 %v1027_v39, %v2592_v57  ;;  %v1035_v26 = vmul.f32 %v1031_v52, %v2593_v38  ;;  %v1063_v22 = vrot.slane %v1055_v51, %v1984_v61 }
 0x1a0   : > { %v1032_v32 = vmul.f32 %v1027_v39, %v1016_v24  ;;  %v1033_v6 = vmul.f32 %v1031_v52, %v1018_v34  ;;  %v1049_v44 = vsel %vm648_vm6, %v2399_v7, %v1047_v0  ;;  %v1051_v10 = vsel %vm648_vm6, %v1047_v0, %v2399_v7  ;;  %v1077_v7 = vpop.permute.xlu0 %1076 }
 0x1a1   : > { %v1038_v62 = vadd.f32 %v1034_v5, %v1006_v48  ;;  %v1039_v46 = vadd.f32 %v1035_v26, %v1007_v12  ;;  %v1048_v49 = vsel %vm648_vm6, %v2401_v30, %v1045_v13  ;;  %v1050_v24 = vsel %vm648_vm6, %v1045_v13, %v2401_v30 }
 0x1a2   : > { %v1036_v58 = vadd.f32 %v1032_v32, %v1004_v54  ;;  %v1037_v53 = vadd.f32 %v1033_v6, %v1005_v16  ;;  %v1084_v63 = vmul.f32 %v2345_v1, %v2594_v60  ;;  %v1085_v3 = vmul.f32 %v2363_v17, %v2595_v29 }
 0x1a3   : > { %v1066_v0 = vmul.f32 %v1059_v19, %v1049_v44  ;;  %v1067_v50 = vmul.f32 %v1063_v22, %v1051_v10  ;;  %v1081_v18 = vsel %vm696_vm7, %v1075_v41, %v1079_v4  ;;  %v1083_v20 = vsel %vm696_vm7, %v1079_v4, %v1075_v41 }
 0x1a4   : > { %v1064_v30 = vmul.f32 %v1059_v19, %v1048_v49  ;;  %v1065_v13 = vmul.f32 %v1063_v22, %v1050_v24  ;;  %v1086_v31 = vmul.f32 %v1084_v63, %v2596_v11  ;;  %v1087_v1 = vmul.f32 %v1085_v3, %v2597_v15 }
 0x1a5   : > { %v1070_v37 = vadd.f32 %v1066_v0, %v1038_v62  ;;  %v1071_v40 = vadd.f32 %v1067_v50, %v1039_v46  ;;  %v1080_v17 = vsel %vm696_vm7, %v1073_v35, %v1077_v7  ;;  %v1082_v47 = vsel %vm696_vm7, %v1077_v7, %v1073_v35 }
 0x1a6   : > { %v1068_v59 = vadd.f32 %v1064_v30, %v1036_v58  ;;  %v1069_v2 = vadd.f32 %v1065_v13, %v1037_v53  ;;  %v1091_v51 = vrot.slane %v1086_v31, %v1984_v61  ;;  %v1095_v41 = vrot.slane %v1087_v1, %v1984_v61 }
 0x1a8   : > { %v1098_v56 = vmul.f32 %v1091_v51, %v1081_v18  ;;  %v1099_v23 = vmul.f32 %v1095_v41, %v1083_v20  ;;  %v1096_v9 = vmul.f32 %v1091_v51, %v1080_v17  ;;  %v1097_v43 = vmul.f32 %v1095_v41, %v1082_v47 }
 0x1aa   : > { %v1102_v21 = vadd.f32 %v1098_v56, %v1070_v37  ;;  %v1103_v8 = vadd.f32 %v1099_v23, %v1071_v40  ;;  %v1100_v42 = vadd.f32 %v1096_v9, %v1068_v59  ;;  %v1101_v33 = vadd.f32 %v1097_v43, %v1069_v2 }
 0x1ac   : > { %1106 = vst [vmem:[%s307_s26 + $0x10] sm:$0xff] %v1102_v21  ;;  %1107 = vst [vmem:[%s307_s26 + $0x18] sm:$0xff] %v1103_v8 }
 0x1ad   : > { %1104 = vst [vmem:[%s307_s26] sm:$0xff] %v1100_v42  ;;  %1105 = vst [vmem:[%s307_s26 + $0x8] sm:$0xff] %v1101_v33 }
 0x1ae   : > { %1525 = shalt.err (!%p1522_p5)
}
 0x1af   : > { %s1526_s12 = scalar_lea.hbm %s2488_s23, 512  ;;  %s1530_s20 = scalar_lea.hbm %s2536_s4, 1024 }
 0x1b0   : > { %p1527_p9 = scmp.ne.s32.totalorder %s2488_s23, %s1526_s12  ;;  %p1531_p11 = scmp.lt.s32.totalorder %s2488_s23, %s2536_s4 }
 0x1b1   : > { %p1532_p3 = scmp.lt.s32.totalorder %s1530_s20, %s1526_s12 }
 0x1b2   : > { %p1528_p10 = pnand %p1527_p9, %p2598_p4 }
 0x1b3   : > { %p1533_p6 = por %p1532_p3, %p1531_p11 }
 0x1b4   : > { %p1529_p8 = pneg %p1528_p10 }
 0x1b6   : > { %p1534_p2 = pnand %p1533_p6, %p1529_p8 }
 0x1b8   : > { %1537 = shalt.err (!%p1534_p2)
}
 0x1b9   : > { %s1603_s22 = smov 256  }
 0x1ba   : > { %1288 = dma.vmem_to_hbm [thread:$0]  (%p2598_p4), %s2483_s19, 512, %s2488_s23, %s1109_s8, %s1603_s22, %s1603_s22, %s1595_s21  }
 0x1bb PF: > { %s2599_s24 = sld [smem:[#allocation15_spill]]  ;;  %s1137_s14 = sand.u32 1, %s1572_s15  }
 0x1bc   : > { %p2600_p13 = scmp.ne.s32.totalorder %s2566_s5, 0  ;;  %s1138_s18 = scalar_lea.sflag [#allocation4], %s1137_s14 }
 0x1c1   : > { %p2601_p1 = scmp.ge.s32.totalorder %s2599_s24, 2 }
 0x1c3   : > { %p1305_p12 = pnand %p2601_p1, %p2600_p13 }
 0x1c5   : > { %p1306_p7 = pneg %p1305_p12 }
 0x1c7   : > { %1567 = dma.done.wait (%p1306_p7), %s1138_s18, 512  }
 0x1c8   : > { %1569 = vsyncadd (%p1306_p7), %s1138_s18, 4294966784  ;;  %s2602_s18 = sld [smem:[#allocation16_spill]]  ;;  %s2604_s15 = smov %s1576_s16 }
 0x1c9   : > { %s2603_s29 = sld [smem:[#allocation17_spill]]  ;;  %s2605_s16 = smov %s1580_s17 }
 0x1ce   : > { %p21_p0 = scmp.ge.s32.totalorder %s2602_s18, 4  }
 0x1cf   : > { %s2606_s17 = smov %s2603_s29 }
 0x1d0   :  { %23 = sbr.rel (!%p21_p0) target bundleno = 11 (0xb), region = 118 }
 0x1d5   :  { %1143 = vsyncpa [#allocation3], 1 }
 0x1d6   :  { %1145 = vsyncpa [#allocation3 + $0x1], 1 }
 0x1d7   :  { %1146 = vsyncpa [#allocation6], 1 }
 0x1d8   :  { %1148 = vsyncpa [#allocation6 + $0x1], 1 }
 0x1d9   :  { %1149 = vsyncpa [#allocation9], 1 }
 0x1da   :  { %1151 = vsyncpa [#allocation9 + $0x1], 1 }
 0x1db   :  { %1152 = vsyncpa [#allocation4], 1 }
 0x1dc   :  { %1154 = vsyncpa [#allocation4 + $0x1], 1 }

</bundles_post_ra>
